<compile_context>
chip_gen: v5e
topology: v5e:2x2
jax: 0.10.0
libtpu: 0.0.40
codegen_flags: <defaults>
</compile_context>

<pallas_src>
import math

import numpy as np
import jax
import jax.numpy as jnp
from jax.experimental import pallas as pl
from jax.experimental.pallas import tpu as pltpu

# ----------------------- TKL_2 hyper-parameters (small) -----------------------
EMB = 32
KERNELS_MU = [1.0, 0.9, 0.7, 0.5, 0.3, 0.1, -0.1, -0.3, -0.5, -0.7, -0.9]
KERNELS_SIGMA = [0.001] + [0.1] * 10
N_KERNELS = len(KERNELS_MU)
_INV_2SIG2 = tuple(float(1.0 / (2.0 * s * s)) for s in KERNELS_SIGMA)
ATT_HEADS = 2
ATT_LAYERS = 1
ATT_FF = 32
CHUNK_SIZE = 40
OVERLAP = 5
EXT_CHUNK = CHUNK_SIZE + 2 * OVERLAP            # 50
SLIDING_WINDOW = 30
TOP_K_CHUNKS = 3
USE_POS_ENCODING = True
BATCH_BLOCK = 8                                  # documents per grid step


# =========================== fused Pallas kernel ==============================
# One grid step = BATCH_BLOCK documents.  All tensors arrive lane-dense:
#   qn    (Bt, Q, E)          L2-normalized contextualized queries
#   dnt   (Bt, E, Lp)         L2-normalized contextualized docs (chunk-flattened)
#   bias  (Bt, Lp)            30.0 on masked/padded doc positions, 0 elsewhere
#   gate  (Bt, Wp)            1.0 iff window contains >=1 valid doc position
#   W     (Lp, Wp)            window indicator: W[d, w] = 1 iff 2w <= d < 2w+30
#   km    (K, Wp)             kernel_mult[0] broadcast across lanes
#   bd    (1, Bt, K*Bt*Q)     block-diag weights: dense_w[k]*qmask[b,q] on the
#                             diagonal block of batch element b (rows = (k,b,q))
# Output: (Bt, Wp)            per-window scores.
def _tkl_fused_body(qn_ref, dnt_ref, bias_ref, gate_ref, w_ref, km_ref, bd_ref,
                    out_ref):
    bt, q_len, _ = qn_ref.shape
    l_pad = dnt_ref.shape[2]
    w_pad = w_ref.shape[1]

    qn = qn_ref[...]                      # (Bt, Q, E)
    dnt = dnt_ref[...]                    # (Bt, E, Lp)
    w_mat = w_ref[...]                    # (Lp, Wp)
    km = km_ref[...]                      # (K, Wp)

    # batched cosine matrix on the MXU (operands pre-normalized in the wrapper)
    cos = jnp.einsum('bqe,bel->bql', qn, dnt,
                     preferred_element_type=jnp.float32)          # (Bt, Q, Lp)
    # doc mask: shift masked positions far outside [-1, 1]; every Gaussian
    # underflows to exactly 0 there (identical to activations * doc_mask).
    cos = (cos + bias_ref[...][:, None, :]).reshape(bt * q_len, l_pad)

    # Gaussian soft-histogram kernels; mu / 1/(2 sigma^2) are compile-time
    # immediates.  Rows ordered (k, b, q); 2-D concat keeps the layout trivial.
    g = jnp.concatenate(
        [jnp.exp(-jnp.square(cos - KERNELS_MU[k]) * _INV_2SIG2[k])
         for k in range(N_KERNELS)], axis=0)                      # (K*Bt*Q, Lp)

    # sliding-window pooling as ONE MXU matmul with the window-indicator matrix
    pkq = jnp.dot(g, w_mat, preferred_element_type=jnp.float32)   # (K*Bt*Q, Wp)

    # log saturation; kernel_mult applied post-pool exactly as in the reference
    sat = jnp.log(jnp.maximum(
        pkq.reshape(N_KERNELS, bt * q_len, w_pad) * km[:, None, :], 1e-10))
    sat = sat.reshape(N_KERNELS * bt * q_len, w_pad)

    # query-mask weighting + sum over (k, q) + dense(K->1) projection fused into
    # a single block-diagonal MXU matvec; empty-window gate applied last so
    # gated windows produce exact 0.0 (downstream `score == 0` sentinel).
    out = jnp.dot(bd_ref[0], sat, preferred_element_type=jnp.float32)  # (Bt, Wp)
    out_ref[...] = out * gate_ref[...]


def fused_tk_scoring(qn, dnt, doc_bias, gate, w_mat, km_lane, bd, *, block_b):
    """Batched fused TK scoring.  Returns per-window scores (B_pad, Wp)."""
    B_pad, Q, E = qn.shape
    Lp = dnt.shape[2]
    Wp = w_mat.shape[1]
    K = km_lane.shape[0]
    nb = B_pad // block_b
    kbq = K * block_b * Q
    return pl.pallas_call(
        _tkl_fused_body,
        out_shape=jax.ShapeDtypeStruct((B_pad, Wp), jnp.float32),
        grid=(nb,),
        in_specs=[
            pl.BlockSpec((block_b, Q, E), lambda b: (b, 0, 0)),
            pl.BlockSpec((block_b, E, Lp), lambda b: (b, 0, 0)),
            pl.BlockSpec((block_b, Lp), lambda b: (b, 0)),
            pl.BlockSpec((block_b, Wp), lambda b: (b, 0)),
            pl.BlockSpec((Lp, Wp), lambda b: (0, 0)),
            pl.BlockSpec((K, Wp), lambda b: (0, 0)),
            pl.BlockSpec((1, block_b, kbq), lambda b: (b, 0, 0)),
        ],
        out_specs=pl.BlockSpec((block_b, Wp), lambda b: (b, 0)),
        compiler_params=pltpu.CompilerParams(
            dimension_semantics=("parallel",),
            vmem_limit_bytes=32 * 1024 * 1024,
        ),
    )(qn, dnt, doc_bias, gate, w_mat, km_lane, bd)


# ============================ plain-JAX glue pieces ============================
def get_positional_features(dim, max_len):
    positions = np.arange(max_len, dtype=np.float32)
    num_ts = dim // 2
    ts = np.arange(num_ts, dtype=np.float32)
    log_inc = math.log(10000.0 / 1.0) / float(num_ts - 1)
    inv = np.exp(ts * -log_inc)
    scaled = positions[:, None] * inv[None, :]
    sinus = np.concatenate([np.sin(scaled), np.cos(scaled)], axis=1)
    if dim % 2 != 0:
        sinus = np.concatenate([sinus, np.zeros((max_len, 1), np.float32)], axis=1)
    return sinus[None].astype(np.float32)          # (1, max_len, dim)


def layer_norm(x, w, b, eps=1e-5):
    mu = jnp.mean(x, axis=-1, keepdims=True)
    var = jnp.mean(jnp.square(x - mu), axis=-1, keepdims=True)
    return (x - mu) / jnp.sqrt(var + eps) * w + b


def multi_head_attention(x, valid_mask, p):
    N, S, E = x.shape
    H, hd = ATT_HEADS, E // ATT_HEADS
    qkv = x @ p['in_w'].T + p['in_b']
    q, k, v = jnp.split(qkv, 3, axis=-1)

    def heads(t):
        return jnp.transpose(t.reshape(N, S, H, hd), (0, 2, 1, 3))
    q, k, v = heads(q), heads(k), heads(v)
    scores = jnp.einsum('nhqd,nhkd->nhqk', q, k) / math.sqrt(hd)
    bias = jnp.where(valid_mask[:, None, None, :] > 0, 0.0, -1e9)
    attn = jax.nn.softmax(scores + bias, axis=-1)
    o = jnp.einsum('nhqk,nhkd->nhqd', attn, v)
    o = jnp.transpose(o, (0, 2, 1, 3)).reshape(N, S, E)
    return o @ p['out_w'].T + p['out_b']


def encoder_layer(x, valid_mask, p):
    x = x + multi_head_attention(x, valid_mask, p)          # dropout = 0
    x = layer_norm(x, p['n1_w'], p['n1_b'])
    ff = jax.nn.relu(x @ p['l1_w'].T + p['l1_b']) @ p['l2_w'].T + p['l2_b']
    x = x + ff
    return layer_norm(x, p['n2_w'], p['n2_b'])


def contextualize(x, valid_mask, params):
    # module's own LayerNorm, then the TransformerEncoder (post-norm, relu, no dropout)
    x = layer_norm(x, params['ln_w'], params['ln_b'])
    for lp in params['layers']:
        x = encoder_layer(x, valid_mask, lp)
    return x


def _l2_normalize(x):
    return x / (jnp.sqrt(jnp.sum(x * x, axis=-1, keepdims=True)) + 1e-13)


# ================================ TKL_2 forward ================================
def tkl2_forward(params, query_embeddings, document_embeddings,
                 query_pad_oov_mask, document_pad_oov_mask):
    B, Q, E = query_embeddings.shape

    # ---- query representation (normalization hoisted out of the kernel) ----
    q_in = query_embeddings
    if USE_POS_ENCODING:
        q_in = q_in + params['pos_q'][:, :Q, :]
    q_ctx = contextualize(q_in, query_pad_oov_mask, params)
    qn = _l2_normalize(q_ctx).astype(jnp.float32)                 # (B, Q, E)

    # ---- document chunking (all chunks kept; the doc mask zeroes empty ones,
    #      identical to torch's pack -> compute -> scatter-into-zeros) ----
    doc_len = document_embeddings.shape[1]
    if doc_len > OVERLAP:
        needed_padding = EXT_CHUNK - (doc_len % CHUNK_SIZE - OVERLAP)
    else:
        needed_padding = EXT_CHUNK - OVERLAP - doc_len
    d_pad = jnp.pad(document_embeddings, ((0, 0), (OVERLAP, needed_padding), (0, 0)))
    m_pad = jnp.pad(document_pad_oov_mask, ((0, 0), (OVERLAP, needed_padding)))
    padded_len = d_pad.shape[1]
    chunk_pieces = (padded_len - EXT_CHUNK) // CHUNK_SIZE + 1
    starts = [i * CHUNK_SIZE for i in range(chunk_pieces)]
    chunked_docs = jnp.stack([d_pad[:, s:s + EXT_CHUNK, :] for s in starts], axis=1)
    chunked_mask = jnp.stack([m_pad[:, s:s + EXT_CHUNK] for s in starts], axis=1)
    chunked_docs2 = chunked_docs.reshape(-1, EXT_CHUNK, E)        # (B*C, 50, E)
    chunked_mask2 = chunked_mask.reshape(-1, EXT_CHUNK)           # (B*C, 50)

    d_in = chunked_docs2
    if USE_POS_ENCODING:
        d_in = d_in + params['pos_d'][:, :EXT_CHUNK, :]
    d_ctx = contextualize(d_in, chunked_mask2, params)            # (B*C, 50, E)
    d_inner = d_ctx[:, OVERLAP:-OVERLAP, :]                       # (B*C, 40, E)
    m_inner = chunked_mask2[:, OVERLAP:-OVERLAP]                  # (B*C, 40)

    # flatten chunks into per-document position axis L = C*40, lane-pad to 128
    dn = _l2_normalize(d_inner).reshape(B, chunk_pieces * CHUNK_SIZE, E)
    m_doc = m_inner.reshape(B, chunk_pieces * CHUNK_SIZE).astype(jnp.float32)
    L = dn.shape[1]
    L_eff = max(L, SLIDING_WINDOW)
    n_windows = (L_eff - SLIDING_WINDOW) // 2 + 1
    l_pad = ((L_eff + 127) // 128) * 128
    w_pad = ((max(n_windows, 1) + 127) // 128) * 128

    dn = jnp.pad(dn, ((0, 0), (0, l_pad - L), (0, 0)))
    dnt = jnp.transpose(dn, (0, 2, 1)).astype(jnp.float32)        # (B, E, Lp)
    dmask = jnp.pad(m_doc, ((0, 0), (0, l_pad - L)))              # (B, Lp)
    qmask = query_pad_oov_mask.astype(jnp.float32)                # (B, Q)

    # ---- pad batch to a multiple of BATCH_BLOCK (padded rows score exactly 0) ----
    Bt = BATCH_BLOCK
    B_pad = ((B + Bt - 1) // Bt) * Bt
    pad_b = B_pad - B
    if pad_b:
        qn = jnp.pad(qn, ((0, pad_b), (0, 0), (0, 0)))
        dnt = jnp.pad(dnt, ((0, pad_b), (0, 0), (0, 0)))
        dmask = jnp.pad(dmask, ((0, pad_b), (0, 0)))
        qmask = jnp.pad(qmask, ((0, pad_b), (0, 0)))
    nb = B_pad // Bt

    # window-indicator matrix (static, built from shapes only)
    w_np = np.zeros((l_pad, w_pad), np.float32)
    for w in range(n_windows):
        w_np[2 * w: 2 * w + SLIDING_WINDOW, w] = 1.0
    w_mat = jnp.asarray(w_np)

    # doc-mask bias (exact replacement for per-kernel mask multiplies) and the
    # empty-window gate (window has >= 1 valid doc position), both in wrapper.
    doc_bias = (1.0 - dmask) * 30.0                               # (B_pad, Lp)
    gate = (jnp.dot(dmask, w_mat) > 0.0).astype(jnp.float32)      # (B_pad, Wp)

    # kernel_mult[0], lane-broadcast for a cheap in-kernel multiply
    km_lane = jnp.broadcast_to(
        params['kernel_mult0'].astype(jnp.float32)[:, None], (N_KERNELS, w_pad))

    # block-diagonal weights: dense(K->1) + query mask + sum over (k, q) as one matvec
    dw = params['dense_w'][0].astype(jnp.float32)                 # (K,)
    eye = jnp.eye(Bt, dtype=jnp.float32)
    qm3 = qmask.reshape(nb, Bt, Q)
    bd = jnp.einsum('k,gjq,jm->gjkmq', dw, qm3, eye)              # (nb,Bt,K,Bt,Q)
    bd = bd.reshape(nb, Bt, N_KERNELS * Bt * Q)

    # ---- fused Pallas kernel: cosine + kernels + window pooling + sat + dense ----
    score = fused_tk_scoring(qn, dnt, doc_bias, gate, w_mat, km_lane, bd,
                             block_b=Bt)[:B, :n_windows]          # (B, n_windows)

    # ---- top-k non-overlapping chunk selection (plain JAX control flow) ----
    if score.shape[1] < TOP_K_CHUNKS:
        score = jnp.pad(score, ((0, 0), (0, TOP_K_CHUNKS - score.shape[1])))
    score = jnp.where(score == 0, -9900.0, score)
    orig_score = score
    nwin = score.shape[1]

    r = jnp.arange(nwin)
    max_per_region = score
    top_idx = []
    for c in range(TOP_K_CHUNKS):
        best = jnp.argmax(max_per_region, axis=1)
        top_idx.append(best)
        region = jnp.abs(r[None, :] - best[:, None]) < SLIDING_WINDOW / 2
        max_per_region = jnp.where(region, -10001.0 - c, max_per_region)
    top_idx = jnp.stack(top_idx, axis=1)
    neigh = jnp.concatenate(
        [top_idx, top_idx - 1, top_idx + 1, top_idx - 2, top_idx + 2], axis=1)
    neigh = jnp.clip(neigh, 0, nwin - 1)
    flat = (neigh + jnp.arange(0, B * nwin, nwin)[:, None]).reshape(-1)
    top_k = orig_score.reshape(-1)[flat].reshape(B, -1)
    top_k = jnp.where(top_k <= -9900, 0.0, top_k)
    final_score = (top_k * params['chunk_scoring']).sum(axis=1)   # (B,)
    return final_score


# ============================== parameter setup ================================
def init_params(key):
    keys = jax.random.split(key, 8)
    E, FF = EMB, ATT_FF

    def rnd(k, shape, scale=0.05):
        return jax.random.normal(k, shape, jnp.float32) * scale

    layer = {
        'in_w': rnd(keys[0], (3 * E, E)), 'in_b': jnp.zeros((3 * E,), jnp.float32),
        'out_w': rnd(keys[1], (E, E)), 'out_b': jnp.zeros((E,), jnp.float32),
        'l1_w': rnd(keys[2], (FF, E)), 'l1_b': jnp.zeros((FF,), jnp.float32),
        'l2_w': rnd(keys[3], (E, FF)), 'l2_b': jnp.zeros((E,), jnp.float32),
        'n1_w': jnp.ones((E,), jnp.float32), 'n1_b': jnp.zeros((E,), jnp.float32),
        'n2_w': jnp.ones((E,), jnp.float32), 'n2_b': jnp.zeros((E,), jnp.float32),
    }
    pos = jnp.asarray(get_positional_features(E, EXT_CHUNK))      # re_use_encoding=True
    return {
        'layers': [layer] * ATT_LAYERS,
        'ln_w': jnp.ones((E,), jnp.float32), 'ln_b': jnp.zeros((E,), jnp.float32),
        'pos_q': pos,
        'pos_d': pos,                                             # use_diff_posencoding=False
        'kernel_mult0': jnp.ones((N_KERNELS,), jnp.float32),      # kernel_mult[0]
        'chunk_scoring': jnp.ones((1, TOP_K_CHUNKS * 5), jnp.float32),
        'dense_w': jax.random.uniform(keys[4], (1, N_KERNELS),
                                      jnp.float32, -0.014, 0.014),
    }


# ==================================== main =====================================
if __name__ == "__main__":
    key = jax.random.PRNGKey(0)
    kp, kq, kd = jax.random.split(key, 3)
    params = init_params(kp)

    B, Q_LEN, DOC_LEN = 2, 8, 70
    query_embeddings = jax.random.normal(kq, (B, Q_LEN, EMB), jnp.float32)
    document_embeddings = jax.random.normal(kd, (B, DOC_LEN, EMB), jnp.float32)
    query_pad_oov_mask = jnp.ones((B, Q_LEN), jnp.float32).at[1, Q_LEN - 1].set(0.0)
    document_pad_oov_mask = jnp.stack([
        jnp.where(jnp.arange(DOC_LEN) < 60, 1.0, 0.0),
        jnp.where(jnp.arange(DOC_LEN) < 35, 1.0, 0.0),
    ]).astype(jnp.float32)

    forward = jax.jit(tkl2_forward)
    score = forward(params, query_embeddings, document_embeddings,
                    query_pad_oov_mask, document_pad_oov_mask)
    score = jax.block_until_ready(score)
    assert score.shape == (B,)
    assert bool(jnp.all(jnp.isfinite(score)))
    print("KERNEL_OK")
</pallas_src>

<mosaic_0001>
module attributes {stable_mosaic.version = 11 : i64} {
  func.func @_tkl_fused_body(%arg0: i32, %arg1: memref<8x8x32xf32, #tpu.memory_space<vmem>>, %arg2: memref<8x32x128xf32, #tpu.memory_space<vmem>>, %arg3: memref<8x128xf32, #tpu.memory_space<vmem>>, %arg4: memref<8x128xf32, #tpu.memory_space<vmem>>, %arg5: memref<128x128xf32, #tpu.memory_space<vmem>>, %arg6: memref<11x128xf32, #tpu.memory_space<vmem>>, %arg7: memref<1x8x704xf32, #tpu.memory_space<vmem>>, %arg8: memref<8x128xf32, #tpu.memory_space<vmem>>) attributes {dimension_semantics = [#tpu.dimension_semantics<parallel>], iteration_bounds = array<i64: 1>, scalar_prefetch = 0 : i64, scratch_operands = 0 : i64, tpu.core_type = #tpu.core_type<tc>, window_params = [{transform_indices = @transform_0, window_bounds = array<i64: 8, 8, 32>}, {transform_indices = @transform_1, window_bounds = array<i64: 8, 32, 128>}, {transform_indices = @transform_2, window_bounds = array<i64: 8, 128>}, {transform_indices = @transform_3, window_bounds = array<i64: 8, 128>}, {pipeline_mode = #tpu.pipeline_mode<synchronous>, transform_indices = @transform_4, window_bounds = array<i64: 128, 128>}, {pipeline_mode = #tpu.pipeline_mode<synchronous>, transform_indices = @transform_5, window_bounds = array<i64: 11, 128>}, {transform_indices = @transform_6, window_bounds = array<i64: 1, 8, 704>}, {transform_indices = @transform_7, window_bounds = array<i64: 8, 128>}]} {
    %c0 = arith.constant 0 : index
    %c0_0 = arith.constant 0 : index
    %c0_1 = arith.constant 0 : index
    %0 = vector.load %arg1[%c0, %c0_0, %c0_1] : memref<8x8x32xf32, #tpu.memory_space<vmem>>, vector<8x8x32xf32>
    %c0_2 = arith.constant 0 : index
    %c0_3 = arith.constant 0 : index
    %c0_4 = arith.constant 0 : index
    %1 = vector.load %arg2[%c0_2, %c0_3, %c0_4] : memref<8x32x128xf32, #tpu.memory_space<vmem>>, vector<8x32x128xf32>
    %c0_5 = arith.constant 0 : index
    %c0_6 = arith.constant 0 : index
    %2 = vector.load %arg5[%c0_5, %c0_6] : memref<128x128xf32, #tpu.memory_space<vmem>>, vector<128x128xf32>
    %c0_7 = arith.constant 0 : index
    %c0_8 = arith.constant 0 : index
    %3 = vector.load %arg6[%c0_7, %c0_8] : memref<11x128xf32, #tpu.memory_space<vmem>>, vector<11x128xf32>
    "tpu.trace_start"() <{level = 10 : i32, message = "bqe,bel->bql"}> : () -> ()
    %cst = arith.constant dense<0.000000e+00> : vector<8x8x128xf32>
    %4 = tpu.matmul %0, %1, %cst {dimension_numbers = #tpu.dot_dimension_numbers<[2], [1], [1], [2], [0, 0, 0, 1, 1, 2], [0], [0]>} : vector<8x8x32xf32>, vector<8x32x128xf32>, vector<8x8x128xf32> -> vector<8x8x128xf32>
    "tpu.trace_stop"() : () -> ()
    %c0_9 = arith.constant 0 : index
    %c0_10 = arith.constant 0 : index
    %5 = vector.load %arg3[%c0_9, %c0_10] : memref<8x128xf32, #tpu.memory_space<vmem>>, vector<8x128xf32>
    %6 = vector.shape_cast %5 : vector<8x128xf32> to vector<8x1x128xf32>
    %7 = vector.broadcast %6 : vector<8x1x128xf32> to vector<8x8x128xf32>
    %8 = arith.addf %4, %7 : vector<8x8x128xf32>
    %9 = vector.shape_cast %8 : vector<8x8x128xf32> to vector<64x128xf32>
    %cst_11 = arith.constant 1.000000e+00 : f32
    %10 = vector.broadcast %cst_11 : f32 to vector<64x128xf32>
    %11 = arith.subf %9, %10 : vector<64x128xf32>
    %12 = arith.mulf %11, %11 : vector<64x128xf32>
    %cst_12 = arith.constant 0.000000e+00 : f32
    %13 = vector.broadcast %cst_12 : f32 to vector<64x128xf32>
    %14 = arith.subf %13, %12 : vector<64x128xf32>
    %cst_13 = arith.constant 5.000000e+05 : f32
    %15 = vector.broadcast %cst_13 : f32 to vector<64x128xf32>
    %16 = arith.mulf %14, %15 : vector<64x128xf32>
    %17 = math.exp %16 : vector<64x128xf32>
    %cst_14 = arith.constant 0.899999976 : f32
    %18 = vector.broadcast %cst_14 : f32 to vector<64x128xf32>
    %19 = arith.subf %9, %18 : vector<64x128xf32>
    %20 = arith.mulf %19, %19 : vector<64x128xf32>
    %cst_15 = arith.constant 0.000000e+00 : f32
    %21 = vector.broadcast %cst_15 : f32 to vector<64x128xf32>
    %22 = arith.subf %21, %20 : vector<64x128xf32>
    %cst_16 = arith.constant 5.000000e+01 : f32
    %23 = vector.broadcast %cst_16 : f32 to vector<64x128xf32>
    %24 = arith.mulf %22, %23 : vector<64x128xf32>
    %25 = math.exp %24 : vector<64x128xf32>
    %cst_17 = arith.constant 0.699999988 : f32
    %26 = vector.broadcast %cst_17 : f32 to vector<64x128xf32>
    %27 = arith.subf %9, %26 : vector<64x128xf32>
    %28 = arith.mulf %27, %27 : vector<64x128xf32>
    %cst_18 = arith.constant 0.000000e+00 : f32
    %29 = vector.broadcast %cst_18 : f32 to vector<64x128xf32>
    %30 = arith.subf %29, %28 : vector<64x128xf32>
    %cst_19 = arith.constant 5.000000e+01 : f32
    %31 = vector.broadcast %cst_19 : f32 to vector<64x128xf32>
    %32 = arith.mulf %30, %31 : vector<64x128xf32>
    %33 = math.exp %32 : vector<64x128xf32>
    %cst_20 = arith.constant 5.000000e-01 : f32
    %34 = vector.broadcast %cst_20 : f32 to vector<64x128xf32>
    %35 = arith.subf %9, %34 : vector<64x128xf32>
    %36 = arith.mulf %35, %35 : vector<64x128xf32>
    %cst_21 = arith.constant 0.000000e+00 : f32
    %37 = vector.broadcast %cst_21 : f32 to vector<64x128xf32>
    %38 = arith.subf %37, %36 : vector<64x128xf32>
    %cst_22 = arith.constant 5.000000e+01 : f32
    %39 = vector.broadcast %cst_22 : f32 to vector<64x128xf32>
    %40 = arith.mulf %38, %39 : vector<64x128xf32>
    %41 = math.exp %40 : vector<64x128xf32>
    %cst_23 = arith.constant 3.000000e-01 : f32
    %42 = vector.broadcast %cst_23 : f32 to vector<64x128xf32>
    %43 = arith.subf %9, %42 : vector<64x128xf32>
    %44 = arith.mulf %43, %43 : vector<64x128xf32>
    %cst_24 = arith.constant 0.000000e+00 : f32
    %45 = vector.broadcast %cst_24 : f32 to vector<64x128xf32>
    %46 = arith.subf %45, %44 : vector<64x128xf32>
    %cst_25 = arith.constant 5.000000e+01 : f32
    %47 = vector.broadcast %cst_25 : f32 to vector<64x128xf32>
    %48 = arith.mulf %46, %47 : vector<64x128xf32>
    %49 = math.exp %48 : vector<64x128xf32>
    %cst_26 = arith.constant 1.000000e-01 : f32
    %50 = vector.broadcast %cst_26 : f32 to vector<64x128xf32>
    %51 = arith.subf %9, %50 : vector<64x128xf32>
    %52 = arith.mulf %51, %51 : vector<64x128xf32>
    %cst_27 = arith.constant 0.000000e+00 : f32
    %53 = vector.broadcast %cst_27 : f32 to vector<64x128xf32>
    %54 = arith.subf %53, %52 : vector<64x128xf32>
    %cst_28 = arith.constant 5.000000e+01 : f32
    %55 = vector.broadcast %cst_28 : f32 to vector<64x128xf32>
    %56 = arith.mulf %54, %55 : vector<64x128xf32>
    %57 = math.exp %56 : vector<64x128xf32>
    %cst_29 = arith.constant -1.000000e-01 : f32
    %58 = vector.broadcast %cst_29 : f32 to vector<64x128xf32>
    %59 = arith.subf %9, %58 : vector<64x128xf32>
    %60 = arith.mulf %59, %59 : vector<64x128xf32>
    %cst_30 = arith.constant 0.000000e+00 : f32
    %61 = vector.broadcast %cst_30 : f32 to vector<64x128xf32>
    %62 = arith.subf %61, %60 : vector<64x128xf32>
    %cst_31 = arith.constant 5.000000e+01 : f32
    %63 = vector.broadcast %cst_31 : f32 to vector<64x128xf32>
    %64 = arith.mulf %62, %63 : vector<64x128xf32>
    %65 = math.exp %64 : vector<64x128xf32>
    %cst_32 = arith.constant -3.000000e-01 : f32
    %66 = vector.broadcast %cst_32 : f32 to vector<64x128xf32>
    %67 = arith.subf %9, %66 : vector<64x128xf32>
    %68 = arith.mulf %67, %67 : vector<64x128xf32>
    %cst_33 = arith.constant 0.000000e+00 : f32
    %69 = vector.broadcast %cst_33 : f32 to vector<64x128xf32>
    %70 = arith.subf %69, %68 : vector<64x128xf32>
    %cst_34 = arith.constant 5.000000e+01 : f32
    %71 = vector.broadcast %cst_34 : f32 to vector<64x128xf32>
    %72 = arith.mulf %70, %71 : vector<64x128xf32>
    %73 = math.exp %72 : vector<64x128xf32>
    %cst_35 = arith.constant -5.000000e-01 : f32
    %74 = vector.broadcast %cst_35 : f32 to vector<64x128xf32>
    %75 = arith.subf %9, %74 : vector<64x128xf32>
    %76 = arith.mulf %75, %75 : vector<64x128xf32>
    %cst_36 = arith.constant 0.000000e+00 : f32
    %77 = vector.broadcast %cst_36 : f32 to vector<64x128xf32>
    %78 = arith.subf %77, %76 : vector<64x128xf32>
    %cst_37 = arith.constant 5.000000e+01 : f32
    %79 = vector.broadcast %cst_37 : f32 to vector<64x128xf32>
    %80 = arith.mulf %78, %79 : vector<64x128xf32>
    %81 = math.exp %80 : vector<64x128xf32>
    %cst_38 = arith.constant -0.699999988 : f32
    %82 = vector.broadcast %cst_38 : f32 to vector<64x128xf32>
    %83 = arith.subf %9, %82 : vector<64x128xf32>
    %84 = arith.mulf %83, %83 : vector<64x128xf32>
    %cst_39 = arith.constant 0.000000e+00 : f32
    %85 = vector.broadcast %cst_39 : f32 to vector<64x128xf32>
    %86 = arith.subf %85, %84 : vector<64x128xf32>
    %cst_40 = arith.constant 5.000000e+01 : f32
    %87 = vector.broadcast %cst_40 : f32 to vector<64x128xf32>
    %88 = arith.mulf %86, %87 : vector<64x128xf32>
    %89 = math.exp %88 : vector<64x128xf32>
    %cst_41 = arith.constant -0.899999976 : f32
    %90 = vector.broadcast %cst_41 : f32 to vector<64x128xf32>
    %91 = arith.subf %9, %90 : vector<64x128xf32>
    %92 = arith.mulf %91, %91 : vector<64x128xf32>
    %cst_42 = arith.constant 0.000000e+00 : f32
    %93 = vector.broadcast %cst_42 : f32 to vector<64x128xf32>
    %94 = arith.subf %93, %92 : vector<64x128xf32>
    %cst_43 = arith.constant 5.000000e+01 : f32
    %95 = vector.broadcast %cst_43 : f32 to vector<64x128xf32>
    %96 = arith.mulf %94, %95 : vector<64x128xf32>
    %97 = math.exp %96 : vector<64x128xf32>
    %98 = tpu.concatenate %17, %25, %33, %41, %49, %57, %65, %73, %81, %89, %97 in 0 : vector<64x128xf32>, vector<64x128xf32>, vector<64x128xf32>, vector<64x128xf32>, vector<64x128xf32>, vector<64x128xf32>, vector<64x128xf32>, vector<64x128xf32>, vector<64x128xf32>, vector<64x128xf32>, vector<64x128xf32> -> vector<704x128xf32>
    %cst_44 = arith.constant dense<0.000000e+00> : vector<704x128xf32>
    %99 = tpu.matmul %98, %2, %cst_44 {dimension_numbers = #tpu.dot_dimension_numbers<[1], [0], [0], [1], [0, 0, 1, 1], [], []>} : vector<704x128xf32>, vector<128x128xf32>, vector<704x128xf32> -> vector<704x128xf32>
    %100 = vector.shape_cast %99 : vector<704x128xf32> to vector<11x64x128xf32>
    %101 = vector.shape_cast %3 : vector<11x128xf32> to vector<11x1x128xf32>
    %102 = vector.broadcast %101 : vector<11x1x128xf32> to vector<11x64x128xf32>
    %103 = arith.mulf %100, %102 : vector<11x64x128xf32>
    %cst_45 = arith.constant 1.000000e-10 : f32
    %104 = vector.broadcast %cst_45 : f32 to vector<11x64x128xf32>
    %105 = arith.maximumf %103, %104 : vector<11x64x128xf32>
    %106 = math.log %105 : vector<11x64x128xf32>
    %107 = vector.shape_cast %106 : vector<11x64x128xf32> to vector<704x128xf32>
    %c0_46 = arith.constant 0 : index
    %c0_47 = arith.constant 0 : index
    %c0_48 = arith.constant 0 : index
    %108 = vector.load %arg7[%c0_46, %c0_47, %c0_48] : memref<1x8x704xf32, #tpu.memory_space<vmem>>, vector<1x8x704xf32>
    %109 = vector.shape_cast %108 : vector<1x8x704xf32> to vector<8x704xf32>
    %cst_49 = arith.constant dense<0.000000e+00> : vector<8x128xf32>
    %110 = tpu.matmul %109, %107, %cst_49 {dimension_numbers = #tpu.dot_dimension_numbers<[1], [0], [0], [1], [0, 0, 1, 1], [], []>} : vector<8x704xf32>, vector<704x128xf32>, vector<8x128xf32> -> vector<8x128xf32>
    %c0_50 = arith.constant 0 : index
    %c0_51 = arith.constant 0 : index
    %111 = vector.load %arg4[%c0_50, %c0_51] : memref<8x128xf32, #tpu.memory_space<vmem>>, vector<8x128xf32>
    %112 = arith.mulf %110, %111 : vector<8x128xf32>
    %c0_52 = arith.constant 0 : index
    %c0_53 = arith.constant 0 : index
    %113 = vector.load %arg8[%c0_52, %c0_53] : memref<8x128xf32, #tpu.memory_space<vmem>>, vector<8x128xf32>
    tpu.vector_store %arg8[%c0_52, %c0_53], %112 {strides = array<i32>} : memref<8x128xf32, #tpu.memory_space<vmem>>, vector<8x128xf32>,
    return
  }
  func.func @transform_0(%arg0: i32) -> (i32, i32, i32) {
    %c0_i32 = arith.constant 0 : i32
    %c0_i32_0 = arith.constant 0 : i32
    %c0_i32_1 = arith.constant 0 : i32
    return %arg0, %c0_i32, %c0_i32_0 : i32, i32, i32
  }
  func.func @transform_1(%arg0: i32) -> (i32, i32, i32) {
    %c0_i32 = arith.constant 0 : i32
    %c0_i32_0 = arith.constant 0 : i32
    %c0_i32_1 = arith.constant 0 : i32
    return %arg0, %c0_i32, %c0_i32_0 : i32, i32, i32
  }
  func.func @transform_2(%arg0: i32) -> (i32, i32) {
    %c0_i32 = arith.constant 0 : i32
    %c0_i32_0 = arith.constant 0 : i32
    return %arg0, %c0_i32 : i32, i32
  }
  func.func @transform_3(%arg0: i32) -> (i32, i32) {
    %c0_i32 = arith.constant 0 : i32
    %c0_i32_0 = arith.constant 0 : i32
    return %arg0, %c0_i32 : i32, i32
  }
  func.func @transform_4(%arg0: i32) -> (i32, i32) {
    %c0_i32 = arith.constant 0 : i32
    %c0_i32_0 = arith.constant 0 : i32
    %c0_i32_1 = arith.constant 0 : i32
    return %c0_i32, %c0_i32_0 : i32, i32
  }
  func.func @transform_5(%arg0: i32) -> (i32, i32) {
    %c0_i32 = arith.constant 0 : i32
    %c0_i32_0 = arith.constant 0 : i32
    %c0_i32_1 = arith.constant 0 : i32
    return %c0_i32, %c0_i32_0 : i32, i32
  }
  func.func @transform_6(%arg0: i32) -> (i32, i32, i32) {
    %c0_i32 = arith.constant 0 : i32
    %c0_i32_0 = arith.constant 0 : i32
    %c0_i32_1 = arith.constant 0 : i32
    return %arg0, %c0_i32, %c0_i32_0 : i32, i32, i32
  }
  func.func @transform_7(%arg0: i32) -> (i32, i32) {
    %c0_i32 = arith.constant 0 : i32
    %c0_i32_0 = arith.constant 0 : i32
    return %arg0, %c0_i32 : i32, i32
  }
}

</mosaic_0001>

<bundles_post_ra>
// kernel: tkl2_forward.1
= control target key start
LH: loop header
LB: loop body
LE: loop exit
PB: predicated region body
PF: predicated region fallthrough
CT: control target
= control target key end

     0   :  { %vm109_vm0 = vcmask 261120   ;;  %vm1494_vm1 = vcmask 523264   ;;  %s2770_s1 = inlined_call_operand.vmem [shape: f32[8,32,128], index: 1, kind: input, shape index: {}]   ;;  %s2771_s0 = inlined_call_operand.vmem [shape: f32[8,8,32], index: 0, kind: input, shape index: {}]   ;;  %s2772_s4 = inlined_call_operand.vmem [shape: f32[128,128], index: 4, kind: input, shape index: {}]   ;;  %s2773_s2 = inlined_call_operand.vmem [shape: f32[8,128], index: 2, kind: input, shape index: {}]   ;;  %s2774_s5 = inlined_call_operand.vmem [shape: f32[11,128], index: 5, kind: input, shape index: {}]   ;;  %s2775_s6 = inlined_call_operand.vmem [shape: f32[1,8,704], index: 6, kind: input, shape index: {}]   ;;  %s2776_s3 = inlined_call_operand.vmem [shape: f32[8,128], index: 3, kind: input, shape index: {}]   ;;  %s2777_s7 = inlined_call_operand.vmem [shape: f32[8,128], index: 7, kind: output, shape index: {}]  }
   0x1   :  { %v37_v0 = vld [vmem:[%s2770_s1 + $0x18] sm:$0xff]  ;;  %v36_v2 = vld [vmem:[%s2770_s1 + $0x10] sm:$0xff]  ;;  %v35_v4 = vld [vmem:[%s2770_s1 + $0x8] sm:$0xff] }
   0x2   :  { %v49_v1 = vld [vmem:[%s2770_s1 + $0x78] sm:$0xff]  ;;  %125 = vmatpush.msra.mxu2 %v37_v0  ;;  %v48_v3 = vld [vmem:[%s2770_s1 + $0x70] sm:$0xff]  ;;  %v47_v5 = vld [vmem:[%s2770_s1 + $0x68] sm:$0xff] }
   0x3   :  { %194 = vmatpush.msra.mxu3 %v49_v1  ;;  %v34_v6 = vld [vmem:[%s2770_s1] sm:$0xff]  ;;  %v29_v9 = vld [vmem:[%s2771_s0 + $0x18] sm:$0xff]  ;;  %v40_v12 = vld [vmem:[%s2770_s1 + $0x30] sm:$0xff] }
   0x4   :  { %126 = vmatpush.msra.mxu2 %v36_v2  ;;  %v46_v7 = vld [vmem:[%s2770_s1 + $0x60] sm:$0xff]  ;;  %v41_v10 = vld [vmem:[%s2770_s1 + $0x38] sm:$0xff]  ;;  %v64_v13 = vld [vmem:[%s2770_s1 + $0xf0] sm:$0xff] }
   0x5   :  { %195 = vmatpush.msra.mxu3 %v48_v3  ;;  %v26_v8 = vld [vmem:[%s2771_s0] sm:$0xff]  ;;  %v65_v11 = vld [vmem:[%s2770_s1 + $0xf8] sm:$0xff]  ;;  %v52_v15 = vld [vmem:[%s2770_s1 + $0x90] sm:$0xff] }
   0x6   :  { %127 = vmatpush.msra.mxu2 %v35_v4  ;;  %v53_v14 = vld [vmem:[%s2770_s1 + $0x98] sm:$0xff]  ;;  %v39_v16 = vld [vmem:[%s2770_s1 + $0x28] sm:$0xff]  ;;  %v56_v20 = vld [vmem:[%s2770_s1 + $0xb0] sm:$0xff] }
   0x7   :  { %196 = vmatpush.msra.mxu3 %v47_v5  ;;  %v63_v17 = vld [vmem:[%s2770_s1 + $0xe8] sm:$0xff]  ;;  %217 = vmatpush.msra.mxu0 %v53_v14  ;;  %v57_v18 = vld [vmem:[%s2770_s1 + $0xb8] sm:$0xff]  ;;  %v38_v21 = vld [vmem:[%s2770_s1 + $0x20] sm:$0xff] }
   0x8   :  { %128 = vmatpush.msra.mxu2 %v34_v6  ;;  %v51_v19 = vld [vmem:[%s2770_s1 + $0x88] sm:$0xff]  ;;  %v62_v22 = vld [vmem:[%s2770_s1 + $0xe0] sm:$0xff]  ;;  %240 = vmatpush.msra.mxu1 %v57_v18  ;;  %v33_v24 = vld [vmem:[%s2771_s0 + $0x38] sm:$0xff] }
   0x9   :  { %197 = vmatpush.msra.mxu3 %v46_v7  ;;  %1625 = vmatmul.msk.f32.vlgmr.msra.gmra.mxu2 %vm109_vm0, %v26_v8  ;;  %v27_v23 = vld [vmem:[%s2771_s0 + $0x8] sm:$0xff]  ;;  %v45_v25 = vld [vmem:[%s2770_s1 + $0x58] sm:$0xff]  ;;  %v50_v26 = vld [vmem:[%s2770_s1 + $0x80] sm:$0xff] }
   0xa   :  { %1628 = vmatmul.msk.f32.vlgmr.msra.gmra.mxu3 %vm109_vm0, %v29_v9  ;;  %148 = vmatpush.msrb.mxu2 %v41_v10  ;;  %v30_v27 = vld [vmem:[%s2771_s0 + $0x20] sm:$0xff]  ;;  %v55_v28 = vld [vmem:[%s2770_s1 + $0xa8] sm:$0xff]  ;;  %v44_v29 = vld [vmem:[%s2770_s1 + $0x50] sm:$0xff] }
   0xb   :  { %286 = vmatpush.msrb.mxu3 %v65_v11  ;;  %218 = vmatpush.msra.mxu0 %v52_v15  ;;  %v81_v30 = vld [vmem:[%s2772_s4 + $0x78] sm:$0xff]  ;;  %v54_v31 = vld [vmem:[%s2770_s1 + $0xa0] sm:$0xff]  ;;  %v43_v32 = vld [vmem:[%s2770_s1 + $0x48] sm:$0xff] }
   0xc   :  { %149 = vmatpush.msrb.mxu2 %v40_v12  ;;  %241 = vmatpush.msra.mxu1 %v56_v20  ;;  %v31_v33 = vld [vmem:[%s2771_s0 + $0x28] sm:$0xff]  ;;  %v80_v34 = vld [vmem:[%s2772_s4 + $0x70] sm:$0xff]  ;;  %v42_v35 = vld [vmem:[%s2770_s1 + $0x40] sm:$0xff] }
   0xd   :  { %287 = vmatpush.msrb.mxu3 %v64_v13  ;;  %219 = vmatpush.msra.mxu0 %v51_v19  ;;  %v28_v36 = vld [vmem:[%s2771_s0 + $0x10] sm:$0xff]  ;;  %v79_v37 = vld [vmem:[%s2772_s4 + $0x68] sm:$0xff]  ;;  %v61_v38 = vld [vmem:[%s2770_s1 + $0xd8] sm:$0xff] }
   0xe   :  { %150 = vmatpush.msrb.mxu2 %v39_v16  ;;  %242 = vmatpush.msra.mxu1 %v55_v28  ;;  %v78_v39 = vld [vmem:[%s2772_s4 + $0x60] sm:$0xff]  ;;  %v60_v40 = vld [vmem:[%s2770_s1 + $0xd0] sm:$0xff]  ;;  %v77_v41 = vld [vmem:[%s2772_s4 + $0x58] sm:$0xff] }
   0xf   :  { %288 = vmatpush.msrb.mxu3 %v63_v17  ;;  %220 = vmatpush.msra.mxu0 %v50_v26  ;;  %v59_v42 = vld [vmem:[%s2770_s1 + $0xc8] sm:$0xff]  ;;  %v76_v43 = vld [vmem:[%s2772_s4 + $0x50] sm:$0xff]  ;;  %v58_v44 = vld [vmem:[%s2770_s1 + $0xc0] sm:$0xff] }
  0x10   :  { %151 = vmatpush.msrb.mxu2 %v38_v21  ;;  %1629 = vmatmul.msk.f32.vlgmr.msra.gmra.mxu0 %vm109_vm0, %v30_v27  ;;  %v32_v45 = vld [vmem:[%s2771_s0 + $0x30] sm:$0xff]  ;;  %v75_v46 = vld [vmem:[%s2772_s4 + $0x48] sm:$0xff]  ;;  %v74_v47 = vld [vmem:[%s2772_s4 + $0x40] sm:$0xff] }
  0x11   :  { %289 = vmatpush.msrb.mxu3 %v62_v22  ;;  %1626 = vmatmul.msk.f32.vlgmr.msrb.gmra.mxu2 %vm109_vm0, %v27_v23  ;;  %v73_v48 = vld [vmem:[%s2772_s4 + $0x38] sm:$0xff]  ;;  %v72_v49 = vld [vmem:[%s2772_s4 + $0x30] sm:$0xff]  ;;  %v71_v50 = vld [vmem:[%s2772_s4 + $0x28] sm:$0xff] }
  0x12   :  { %1632 = vmatmul.msk.f32.vlgmr.msrb.gmra.mxu3 %vm109_vm0, %v33_v24  ;;  %171 = vmatpush.msra.mxu2 %v45_v25  ;;  %v70_v51 = vld [vmem:[%s2772_s4 + $0x20] sm:$0xff]  ;;  %v69_v52 = vld [vmem:[%s2772_s4 + $0x18] sm:$0xff]  ;;  %v68_v53 = vld [vmem:[%s2772_s4 + $0x10] sm:$0xff] }
  0x13   :  { %822 = vmatpush.msrb.mxu0 %v81_v30  ;;  %243 = vmatpush.msra.mxu1 %v54_v31  ;;  %v67_v54 = vld [vmem:[%s2772_s4 + $0x8] sm:$0xff]  ;;  %v66_v55 = vld [vmem:[%s2772_s4] sm:$0xff] }
  0x14   :  { %172 = vmatpush.msra.mxu2 %v44_v29  ;;  %1724 = vmatpush.msra.mxu3 %v81_v30  ;;  %v2342_v56 = vld [vmem:[%s2773_s2] sm:$0xff] }
  0x15   :  { %1630 = vmatmul.msk.f32.vlgmr.msra.gmra.mxu1 %vm109_vm0, %v31_v33  ;;  %823 = vmatpush.msrb.mxu0 %v80_v34  ;;  %v93_v57 = vperm.slane %v2342_v56, 0  ;;  %v88_v59 = vrot.slane %v2342_v56, 3  ;;  %v86_v62 = vrot.slane %v2342_v56, 1  ;;  %v92_v63 = vrot.slane %v2342_v56, 7 }
  0x16   :  { %173 = vmatpush.msra.mxu2 %v43_v32  ;;  %1727 = vmatpush.msra.mxu3 %v80_v34  ;;  %v87_v9 = vrot.slane %v2342_v56, 2  ;;  %v89_v14 = vrot.slane %v2342_v56, 4 }
  0x17   :  { %1722 = vmatpush.msrb.mxu1 %v81_v30  ;;  %824 = vmatpush.msrb.mxu0 %v79_v37  ;;  %v96_v1 = vperm.slane %v88_v59, 0  ;;  %v94_v2 = vperm.slane %v86_v62, 0  ;;  %v100_v3 = vperm.slane %v92_v63, 0 }
  0x18   :  { %174 = vmatpush.msra.mxu2 %v42_v35  ;;  %1730 = vmatpush.msra.mxu3 %v79_v37  ;;  %v95_v19 = vperm.slane %v87_v9, 0  ;;  %v97_v26 = vperm.slane %v89_v14, 0 }
  0x19   :  { %1627 = vmatmul.msk.f32.vlgmr.msra.gmra.mxu2 %vm109_vm0, %v28_v36  ;;  %825 = vmatpush.msrb.mxu0 %v78_v39 }
  0x1a   :  { %263 = vmatpush.msrb.mxu2 %v61_v38  ;;  %1725 = vmatpush.msrb.mxu1 %v80_v34 }
  0x1b   :  { %1733 = vmatpush.msra.mxu3 %v78_v39  ;;  %826 = vmatpush.msrb.mxu0 %v77_v41 }
  0x1c   :  { %264 = vmatpush.msrb.mxu2 %v60_v40  ;;  %1728 = vmatpush.msrb.mxu1 %v79_v37 }
  0x1d   :  { %1736 = vmatpush.msra.mxu3 %v77_v41  ;;  %827 = vmatpush.msrb.mxu0 %v76_v43 }
  0x1e   :  { %265 = vmatpush.msrb.mxu2 %v59_v42  ;;  %1731 = vmatpush.msrb.mxu1 %v78_v39  ;;  %v90_v42 = vrot.slane %v2342_v56, 5 }
  0x1f   :  { %1739 = vmatpush.msra.mxu3 %v76_v43  ;;  %828 = vmatpush.msrb.mxu0 %v75_v46 }
  0x20   :  { %266 = vmatpush.msrb.mxu2 %v58_v44  ;;  %1734 = vmatpush.msrb.mxu1 %v77_v41  ;;  %v98_v59 = vperm.slane %v90_v42, 0 }
  0x21   :  { %1631 = vmatmul.msk.f32.vlgmr.msrb.gmra.mxu2 %vm109_vm0, %v32_v45  ;;  %1742 = vmatpush.msra.mxu3 %v75_v46 }
  0x22   :  { %1723 = vmatpush.msra.mxu2 %v81_v30  ;;  %1737 = vmatpush.msrb.mxu1 %v76_v43 }
  0x23   :  { %829 = vmatpush.msrb.mxu0 %v74_v47  ;;  %1745 = vmatpush.msra.mxu3 %v74_v47 }
  0x24   :  { %1726 = vmatpush.msra.mxu2 %v80_v34  ;;  %1740 = vmatpush.msrb.mxu1 %v75_v46 }
  0x25   :  { %830 = vmatpush.msrb.mxu0 %v73_v48  ;;  %1748 = vmatpush.msra.mxu3 %v73_v48 }
  0x26   :  { %1729 = vmatpush.msra.mxu2 %v79_v37  ;;  %1743 = vmatpush.msrb.mxu1 %v74_v47 }
  0x27   :  { %831 = vmatpush.msrb.mxu0 %v72_v49  ;;  %1751 = vmatpush.msra.mxu3 %v72_v49 }
  0x28   :  { %1732 = vmatpush.msra.mxu2 %v78_v39  ;;  %1746 = vmatpush.msrb.mxu1 %v73_v48 }
  0x29   :  { %832 = vmatpush.msrb.mxu0 %v71_v50  ;;  %1754 = vmatpush.msra.mxu3 %v71_v50 }
  0x2a   :  { %1735 = vmatpush.msra.mxu2 %v77_v41  ;;  %1749 = vmatpush.msrb.mxu1 %v72_v49 }
  0x2b   :  { %833 = vmatpush.msrb.mxu0 %v70_v51  ;;  %1757 = vmatpush.msra.mxu3 %v70_v51 }
  0x2c   :  { %1738 = vmatpush.msra.mxu2 %v76_v43  ;;  %1752 = vmatpush.msrb.mxu1 %v71_v50 }
  0x2d   :  { %834 = vmatpush.msrb.mxu0 %v69_v52  ;;  %1760 = vmatpush.msra.mxu3 %v69_v52 }
  0x2e   :  { %1741 = vmatpush.msra.mxu2 %v75_v46  ;;  %1755 = vmatpush.msrb.mxu1 %v70_v51 }
  0x2f   :  { %835 = vmatpush.msrb.mxu0 %v68_v53  ;;  %1763 = vmatpush.msra.mxu3 %v68_v53 }
  0x30   :  { %1744 = vmatpush.msra.mxu2 %v74_v47  ;;  %1758 = vmatpush.msrb.mxu1 %v69_v52 }
  0x31   :  { %836 = vmatpush.msrb.mxu0 %v67_v54  ;;  %1766 = vmatpush.msra.mxu3 %v67_v54 }
  0x32   :  { %1747 = vmatpush.msra.mxu2 %v73_v48  ;;  %1761 = vmatpush.msrb.mxu1 %v68_v53 }
  0x33   :  { %837 = vmatpush.msrb.mxu0 %v66_v55  ;;  %1769 = vmatpush.msra.mxu3 %v66_v55 }
  0x34   :  { %1750 = vmatpush.msra.mxu2 %v72_v49  ;;  %1764 = vmatpush.msrb.mxu1 %v67_v54 }
  0x36   :  { %1753 = vmatpush.msra.mxu2 %v71_v50  ;;  %1767 = vmatpush.msrb.mxu1 %v66_v55 }
  0x38   :  { %1756 = vmatpush.msra.mxu2 %v70_v51 }
  0x3a   :  { %1759 = vmatpush.msra.mxu2 %v69_v52 }
  0x3c   :  { %1762 = vmatpush.msra.mxu2 %v68_v53 }
  0x3e   :  { %1765 = vmatpush.msra.mxu2 %v67_v54 }
  0x40   :  { %1768 = vmatpush.msra.mxu2 %v66_v55 }
  0x8c   :  { %v130_v58 = vpop.f32.mrf.mxu2 }
  0x8d   :  { %v199_v60 = vpop.f32.mrf.mxu3  ;;  %v2346_v61 = vadd.f32 %v130_v58, %v93_v57  ;;  %v222_v30 = vpop.f32.mrf.mxu0 }
  0x8e   :  { %v2351_v6 = vadd.f32 %v199_v60, %v96_v1  ;;  %v2369_v41 = vadd.f32 %v222_v30, %v97_v26 }
  0x8f   :  { %v1633_v0 = vadd.f32 -1.0, %v2346_v61  ;;  %v1681_v10 = vadd.f32 0.1, %v2346_v61 }
  0x90   :  { %v1636_v21 = vadd.f32 -1.0, %v2351_v6  ;;  %v1660_v22 = vadd.f32 -0.5, %v2351_v6  ;;  %v1700_v31 = vadd.f32 0.5, %v2351_v6  ;;  %v1637_v60 = vadd.f32 -1.0, %v2369_v41 }
  0x91   :  { %v302_v4 = vmul.f32 %v1633_v0, %v1633_v0  ;;  %v590_v20 = vmul.f32 %v1681_v10, %v1681_v10  ;;  %v1661_v62 = vadd.f32 -0.5, %v2369_v41  ;;  %v1701_v14 = vadd.f32 0.5, %v2369_v41 }
  0x92   :  { %v305_v34 = vmul.f32 %v1636_v21, %v1636_v21  ;;  %v449_v35 = vmul.f32 %v1660_v22, %v1660_v22  ;;  %v689_v47 = vmul.f32 %v1700_v31, %v1700_v31  ;;  %v1684_v30 = vadd.f32 0.1, %v2351_v6 }
  0x93   :  { %v310_v5 = vsub.f32 0.0, %v302_v4  ;;  %v598_v33 = vsub.f32 0.0, %v590_v20 }
  0x94   :  { %v153_v7 = vpop.f32.mrf.mxu2  ;;  %v313_v51 = vsub.f32 0.0, %v305_v34  ;;  %v457_v53 = vsub.f32 0.0, %v449_v35 }
  0x95   :  { %v291_v8 = vpop.f32.mrf.mxu3  ;;  %v2355_v11 = vadd.f32 %v153_v7, %v94_v2  ;;  %v318_v13 = vmul.f32 500000.0, %v310_v5  ;;  %v606_v52 = vmul.f32 50.0, %v598_v33  ;;  %v245_v2 = vpop.f32.mrf.mxu1  ;;  %v697_v7 = vsub.f32 0.0, %v689_v47 }
  0x96   :  { %v2357_v12 = vadd.f32 %v291_v8, %v100_v3  ;;  %v321_v3 = vmul.f32 500000.0, %v313_v51 }
  0x97   :  { %v326_v15 = vmul.f32 1.442695, %v318_v13  ;;  %v1634_v16 = vadd.f32 -1.0, %v2355_v11  ;;  %v1698_v18 = vadd.f32 0.5, %v2355_v11  ;;  %v1682_v36 = vadd.f32 0.1, %v2355_v11 }
  0x98   :  { %v1680_v17 = vadd.f32 -0.1, %v2357_v12  ;;  %v614_v4 = vmul.f32 1.442695, %v606_v52  ;;  %v705_v26 = vmul.f32 50.0, %v697_v7 }
  0x99   :  { %1770 = vpow2.f32 %v326_v15  ;;  %v303_v23 = vmul.f32 %v1634_v16, %v1634_v16  ;;  %v687_v25 = vmul.f32 %v1698_v18, %v1698_v18  ;;  %v591_v54 = vmul.f32 %v1682_v36, %v1682_v36 }
  0x9a   :  { %v549_v24 = vmul.f32 %v1680_v17, %v1680_v17  ;;  %v2379_v16 = vadd.f32 %v245_v2, %v98_v59  ;;  %v465_v17 = vmul.f32 50.0, %v457_v53  ;;  %v91_v18 = vrot.slane %v2342_v56, 6 }
  0x9b   :  { %v311_v27 = vsub.f32 0.0, %v303_v23  ;;  %v695_v29 = vsub.f32 0.0, %v687_v25  ;;  %v599_v5 = vsub.f32 0.0, %v591_v54  ;;  %v332_v56 = vmul.f32 1.442695, %v321_v3 }
  0x9c   :  { %v557_v28 = vsub.f32 0.0, %v549_v24  ;;  %v176_v32 = vpop.f32.mrf.mxu2  ;;  %v450_v24 = vmul.f32 %v1661_v62, %v1661_v62  ;;  %v99_v31 = vperm.slane %v91_v18, 0  ;;  %v476_v33 = vmul.f32 1.442695, %v465_v17 }
  0x9d   :  { %v2367_v37 = vadd.f32 %v176_v32, %v95_v19  ;;  %v319_v38 = vmul.f32 500000.0, %v311_v27  ;;  %v703_v40 = vmul.f32 50.0, %v695_v29  ;;  %v306_v19 = vmul.f32 %v1637_v60, %v1637_v60 }
  0x9e   :  { %v565_v39 = vmul.f32 50.0, %v557_v28  ;;  %v607_v28 = vmul.f32 50.0, %v599_v5  ;;  %v690_v29 = vmul.f32 %v1701_v14, %v1701_v14  ;;  %v458_v35 = vsub.f32 0.0, %v450_v24 }
  0x9f   :  { %v1771_v43 = vpop.eup %1770  ;;  %v328_v44 = vmul.f32 1.442695, %v319_v38  ;;  %v712_v46 = vmul.f32 1.442695, %v703_v40  ;;  %v1635_v48 = vadd.f32 -1.0, %v2367_v37  ;;  %v1659_v49 = vadd.f32 -0.5, %v2367_v37 }
  0xa0   :  { %v580_v45 = vmul.f32 1.442695, %v565_v39  ;;  %838 = vmatmul.f32.vlgmr.msrb.gmra.mxu0 %v1771_v43  ;;  %v1699_v50 = vadd.f32 0.5, %v2367_v37  ;;  %v1683_v8 = vadd.f32 0.1, %v2367_v37  ;;  %v314_v32 = vsub.f32 0.0, %v306_v19 }
  0xa1   :  { %1772 = vpow2.f32 %v328_v44  ;;  %v304_v55 = vmul.f32 %v1635_v48, %v1635_v48  ;;  %v448_v57 = vmul.f32 %v1659_v49, %v1659_v49  ;;  %v1638_v36 = vadd.f32 -1.0, %v2379_v16 }
  0xa2   :  { %1774 = vpow2.f32 %v580_v45  ;;  %v688_v58 = vmul.f32 %v1699_v50, %v1699_v50  ;;  %v592_v27 = vmul.f32 %v1683_v8, %v1683_v8  ;;  %v716_v38 = vmul.f32 1.442695, %v705_v26 }
  0xa3   :  { %1776 = vpow2.f32 %v712_v46  ;;  %v312_v63 = vsub.f32 0.0, %v304_v55  ;;  %v456_v0 = vsub.f32 0.0, %v448_v57  ;;  %v1662_v40 = vadd.f32 -0.5, %v2379_v16 }
  0xa4   :  { %v696_v1 = vsub.f32 0.0, %v688_v58  ;;  %1778 = vpow2.f32 %v614_v4  ;;  %v268_v34 = vpop.f32.mrf.mxu2  ;;  %v600_v39 = vsub.f32 0.0, %v592_v27  ;;  %v616_v42 = vmul.f32 1.442695, %v607_v28 }
  0xa5   :  { %v320_v9 = vmul.f32 500000.0, %v312_v63  ;;  %v464_v10 = vmul.f32 50.0, %v456_v0  ;;  %v698_v43 = vsub.f32 0.0, %v690_v29  ;;  %v1702_v44 = vadd.f32 0.5, %v2379_v16 }
  0xa6   :  { %v704_v13 = vmul.f32 50.0, %v696_v1  ;;  %v2386_v46 = vadd.f32 %v268_v34, %v99_v31  ;;  %v322_v47 = vmul.f32 500000.0, %v314_v32  ;;  %v593_v48 = vmul.f32 %v1684_v30, %v1684_v30 }
  0xa7   :  { %v1773_v15 = vpop.eup %1772  ;;  %v330_v21 = vmul.f32 1.442695, %v320_v9  ;;  %v474_v22 = vmul.f32 1.442695, %v464_v10  ;;  %v466_v50 = vmul.f32 50.0, %v458_v35  ;;  %v307_v51 = vmul.f32 %v1638_v36, %v1638_v36 }
  0xa8   :  { %v1775_v20 = vpop.eup %1774  ;;  %841 = vmatmul.f32.gmra.mxu0 %v1773_v15  ;;  %v714_v23 = vmul.f32 1.442695, %v704_v13  ;;  %v608_v53 = vmul.f32 50.0, %v600_v39  ;;  %v451_v54 = vmul.f32 %v1662_v40, %v1662_v40  ;;  %v706_v57 = vmul.f32 50.0, %v698_v43 }
  0xa9   :  { %v1777_v25 = vpop.eup %1776  ;;  %979 = vmatmul.f32.vlgmr.msra.gmra.mxu2 %v1775_v20  ;;  %1780 = vpow2.f32 %v330_v21  ;;  %v691_v58 = vmul.f32 %v1702_v44, %v1702_v44  ;;  %v334_v59 = vmul.f32 1.442695, %v322_v47  ;;  %v601_v60 = vsub.f32 0.0, %v593_v48 }
  0xaa   :  { %1033 = vmatmul.f32.vlgmr.msra.gmra.mxu3 %v1777_v25  ;;  %1782 = vpow2.f32 %v474_v22  ;;  %v1779_v45 = vpop.eup %1778  ;;  %v1639_v62 = vadd.f32 -1.0, %v2386_v46  ;;  %v478_v63 = vmul.f32 1.442695, %v466_v50  ;;  %v315_v0 = vsub.f32 0.0, %v307_v51 }
  0xab   :  { %1784 = vpow2.f32 %v714_v23  ;;  %v1663_v1 = vadd.f32 -0.5, %v2386_v46  ;;  %v618_v3 = vmul.f32 1.442695, %v608_v53  ;;  %v459_v4 = vsub.f32 0.0, %v451_v54 }
  0xac   :  { %1786 = vpow2.f32 %v332_v56  ;;  %v1685_v5 = vadd.f32 0.1, %v2369_v41  ;;  %v718_v8 = vmul.f32 1.442695, %v706_v57  ;;  %v699_v9 = vsub.f32 0.0, %v691_v58 }
  0xad   :  { %1788 = vpow2.f32 %v476_v33  ;;  %v1703_v10 = vadd.f32 0.5, %v2386_v46  ;;  %v609_v14 = vmul.f32 50.0, %v601_v60  ;;  %v308_v15 = vmul.f32 %v1639_v62, %v1639_v62 }
  0xae   :  { %1790 = vpow2.f32 %v716_v38  ;;  %v323_v18 = vmul.f32 500000.0, %v315_v0  ;;  %v452_v19 = vmul.f32 %v1663_v1, %v1663_v1  ;;  %v467_v20 = vmul.f32 50.0, %v459_v4 }
  0xaf   :  { %v1781_v49 = vpop.eup %1780  ;;  %1792 = vpow2.f32 %v616_v42  ;;  %v594_v21 = vmul.f32 %v1685_v5, %v1685_v5  ;;  %v707_v22 = vmul.f32 50.0, %v699_v9  ;;  %v692_v23 = vmul.f32 %v1703_v10, %v1703_v10 }
  0xb0   :  { %v1783_v52 = vpop.eup %1782  ;;  %844 = vmatmul.f32.gmra.mxu0 %v1781_v49  ;;  %1794 = vpow2.f32 %v334_v59  ;;  %v620_v24 = vmul.f32 1.442695, %v609_v14  ;;  %v316_v25 = vsub.f32 0.0, %v308_v15  ;;  %v1640_v26 = vadd.f32 -1.0, %v2357_v12 }
  0xb1   :  { %982 = vmatmul.f32.gmra.mxu2 %v1779_v45  ;;  %v1785_v55 = vpop.eup %1784  ;;  %916 = vmatmul.f32.vlgmr.msrb.gmra.mxu1 %v1783_v52  ;;  %1796 = vpow2.f32 %v478_v63  ;;  %v336_v27 = vmul.f32 1.442695, %v323_v18  ;;  %v460_v28 = vsub.f32 0.0, %v452_v19  ;;  %v1664_v29 = vadd.f32 -0.5, %v2357_v12 }
  0xb2   :  { %1036 = vmatmul.f32.gmra.mxu3 %v1785_v55  ;;  %v1787_v2 = vpop.eup %1786  ;;  %1798 = vpow2.f32 %v618_v3  ;;  %v480_v56 = vmul.f32 1.442695, %v467_v20  ;;  %v602_v31 = vsub.f32 0.0, %v594_v21  ;;  %v1686_v32 = vadd.f32 0.1, %v2379_v16 }
  0xb3   :  { %v1789_v7 = vpop.eup %1788  ;;  %1800 = vpow2.f32 %v718_v8  ;;  %v720_v34 = vmul.f32 1.442695, %v707_v22  ;;  %v700_v35 = vsub.f32 0.0, %v692_v23  ;;  %v1704_v36 = vadd.f32 0.5, %v2357_v12 }
  0xb4   :  { %v1791_v13 = vpop.eup %1790  ;;  %1802 = vpow2.f32 %v620_v24  ;;  %v324_v39 = vmul.f32 500000.0, %v316_v25  ;;  %v309_v40 = vmul.f32 %v1640_v26, %v1640_v26  ;;  %v468_v43 = vmul.f32 50.0, %v460_v28 }
  0xb5   :  { %v1793_v17 = vpop.eup %1792  ;;  %1804 = vpow2.f32 %v336_v27  ;;  %v453_v44 = vmul.f32 %v1664_v29, %v1664_v29  ;;  %v610_v45 = vmul.f32 50.0, %v602_v31  ;;  %v595_v47 = vmul.f32 %v1686_v32, %v1686_v32 }
  0xb6   :  { %v1795_v30 = vpop.eup %1794  ;;  %1806 = vpow2.f32 %v480_v56  ;;  %v708_v48 = vmul.f32 50.0, %v700_v35  ;;  %v693_v49 = vmul.f32 %v1704_v36, %v1704_v36  ;;  %v338_v50 = vmul.f32 1.442695, %v324_v39 }
  0xb7   :  { %v1797_v33 = vpop.eup %1796  ;;  %1808 = vpow2.f32 %v720_v34  ;;  %v317_v51 = vsub.f32 0.0, %v309_v40  ;;  %v482_v52 = vmul.f32 1.442695, %v468_v43  ;;  %v461_v53 = vsub.f32 0.0, %v453_v44 }
  0xb8   :  { %847 = vmatmul.f32.gmra.mxu0 %v1787_v2  ;;  %v1799_v38 = vpop.eup %1798  ;;  %v622_v55 = vmul.f32 1.442695, %v610_v45  ;;  %v603_v57 = vsub.f32 0.0, %v595_v47  ;;  %v1641_v58 = vadd.f32 -0.9, %v2346_v61  ;;  %v701_v62 = vsub.f32 0.0, %v693_v49 }
  0xb9   :  { %985 = vmatmul.f32.gmra.mxu2 %v1793_v17  ;;  %919 = vmatmul.f32.gmra.mxu1 %v1789_v7  ;;  %v1801_v42 = vpop.eup %1800  ;;  %v722_v60 = vmul.f32 1.442695, %v708_v48  ;;  %v1687_v63 = vadd.f32 0.1, %v2386_v46  ;;  %1810 = vpow2.f32 %v338_v50  ;;  %v325_v1 = vmul.f32 500000.0, %v317_v51 }
  0xba   :  { %1039 = vmatmul.f32.gmra.mxu3 %v1791_v13  ;;  %v1803_v54 = vpop.eup %1802  ;;  %v1665_v2 = vadd.f32 -0.3, %v2346_v61  ;;  %1812 = vpow2.f32 %v482_v52  ;;  %v469_v4 = vmul.f32 50.0, %v461_v53  ;;  %v1705_v5 = vadd.f32 0.7, %v2346_v61 }
  0xbb   :  { %v1805_v59 = vpop.eup %1804  ;;  %1814 = vpow2.f32 %v622_v55  ;;  %v611_v7 = vmul.f32 50.0, %v603_v57  ;;  %v350_v8 = vmul.f32 %v1641_v58, %v1641_v58  ;;  %v709_v9 = vmul.f32 50.0, %v701_v62 }
  0xbc   :  { %v1807_v0 = vpop.eup %1806  ;;  %1816 = vpow2.f32 %v722_v60  ;;  %v596_v10 = vmul.f32 %v1687_v63, %v1687_v63  ;;  %v340_v13 = vmul.f32 1.442695, %v325_v1  ;;  %v494_v14 = vmul.f32 %v1665_v2, %v1665_v2 }
  0xbd   :  { %v1809_v3 = vpop.eup %1808  ;;  %v484_v15 = vmul.f32 1.442695, %v469_v4  ;;  %v734_v17 = vmul.f32 %v1705_v5, %v1705_v5  ;;  %v624_v19 = vmul.f32 1.442695, %v611_v7  ;;  %v358_v20 = vsub.f32 0.0, %v350_v8 }
  0xbe   :  { %v1642_v21 = vadd.f32 -0.9, %v2355_v11  ;;  %v724_v23 = vmul.f32 1.442695, %v709_v9  ;;  %v604_v24 = vsub.f32 0.0, %v596_v10  ;;  %1818 = vpow2.f32 %v340_v13 }
  0xbf   :  { %v1811_v18 = vpop.eup %1810  ;;  %v1688_v25 = vadd.f32 0.1, %v2357_v12  ;;  %v502_v27 = vsub.f32 0.0, %v494_v14  ;;  %v1666_v28 = vadd.f32 -0.3, %v2355_v11  ;;  %1820 = vpow2.f32 %v484_v15 }
  0xc0   :  { %850 = vmatmul.f32.gmra.mxu0 %v1795_v30  ;;  %v1813_v22 = vpop.eup %1812  ;;  %v742_v30 = vsub.f32 0.0, %v734_v17  ;;  %v1706_v56 = vadd.f32 0.7, %v2355_v11  ;;  %1822 = vpow2.f32 %v624_v19  ;;  %v366_v31 = vmul.f32 50.0, %v358_v20 }
  0xc1   :  { %988 = vmatmul.f32.gmra.mxu2 %v1799_v38  ;;  %922 = vmatmul.f32.gmra.mxu1 %v1797_v33  ;;  %v1815_v26 = vpop.eup %1814  ;;  %v351_v32 = vmul.f32 %v1642_v21, %v1642_v21  ;;  %1824 = vpow2.f32 %v724_v23  ;;  %v612_v33 = vmul.f32 50.0, %v604_v24  ;;  %v597_v34 = vmul.f32 %v1688_v25, %v1688_v25 }
  0xc2   :  { %1042 = vmatmul.f32.gmra.mxu3 %v1801_v42  ;;  %v1817_v29 = vpop.eup %1816  ;;  %v510_v35 = vmul.f32 50.0, %v502_v27  ;;  %v495_v36 = vmul.f32 %v1666_v28, %v1666_v28  ;;  %v750_v38 = vmul.f32 50.0, %v742_v30  ;;  %v735_v39 = vmul.f32 %v1706_v56, %v1706_v56 }
  0xc3   :  { %v374_v42 = vmul.f32 1.442695, %v366_v31  ;;  %v359_v43 = vsub.f32 0.0, %v351_v32  ;;  %v1643_v44 = vadd.f32 -0.9, %v2367_v37  ;;  %v605_v48 = vsub.f32 0.0, %v597_v34 }
  0xc4   :  { %v1819_v40 = vpop.eup %1818  ;;  %v626_v47 = vmul.f32 1.442695, %v612_v33  ;;  %v1689_v49 = vadd.f32 0.3, %v2346_v61  ;;  %v518_v51 = vmul.f32 1.442695, %v510_v35 }
  0xc5   :  { %v1821_v45 = vpop.eup %1820  ;;  %v503_v52 = vsub.f32 0.0, %v495_v36  ;;  %v1667_v53 = vadd.f32 -0.3, %v2367_v37  ;;  %v758_v55 = vmul.f32 1.442695, %v750_v38  ;;  %v743_v57 = vsub.f32 0.0, %v735_v39 }
  0xc6   :  { %v1823_v50 = vpop.eup %1822  ;;  %v1707_v58 = vadd.f32 0.7, %v2367_v37  ;;  %1826 = vpow2.f32 %v374_v42  ;;  %v352_v60 = vmul.f32 %v1643_v44, %v1643_v44  ;;  %v613_v62 = vmul.f32 50.0, %v605_v48 }
  0xc7   :  { %1828 = vpow2.f32 %v626_v47  ;;  %v638_v63 = vmul.f32 %v1689_v49, %v1689_v49  ;;  %v496_v1 = vmul.f32 %v1667_v53, %v1667_v53  ;;  %v751_v2 = vmul.f32 50.0, %v743_v57 }
  0xc8   :  { %853 = vmatmul.f32.gmra.mxu0 %v1805_v59  ;;  %v367_v59 = vmul.f32 50.0, %v359_v43  ;;  %1830 = vpow2.f32 %v518_v51  ;;  %v360_v5 = vsub.f32 0.0, %v352_v60  ;;  %v1644_v7 = vadd.f32 -0.9, %v2351_v6 }
  0xc9   :  { %991 = vmatmul.f32.gmra.mxu2 %v1803_v54  ;;  %925 = vmatmul.f32.gmra.mxu1 %v1807_v0  ;;  %v1825_v54 = vpop.eup %1824  ;;  %v511_v0 = vmul.f32 50.0, %v503_v52  ;;  %1832 = vpow2.f32 %v758_v55  ;;  %v628_v8 = vmul.f32 1.442695, %v613_v62  ;;  %v646_v9 = vsub.f32 0.0, %v638_v63 }
  0xca   :  { %1045 = vmatmul.f32.gmra.mxu3 %v1809_v3  ;;  %v736_v3 = vmul.f32 %v1707_v58, %v1707_v58  ;;  %v376_v4 = vmul.f32 1.442695, %v367_v59  ;;  %v1690_v10 = vadd.f32 0.3, %v2355_v11  ;;  %v504_v15 = vsub.f32 0.0, %v496_v1 }
  0xcb   :  { %v520_v14 = vmul.f32 1.442695, %v511_v0  ;;  %v1668_v17 = vadd.f32 -0.3, %v2351_v6  ;;  %v760_v19 = vmul.f32 1.442695, %v751_v2  ;;  %v353_v24 = vmul.f32 %v1644_v7, %v1644_v7 }
  0xcc   :  { %v1827_v13 = vpop.eup %1826  ;;  %v744_v20 = vsub.f32 0.0, %v736_v3  ;;  %v1708_v21 = vadd.f32 0.7, %v2351_v6  ;;  %1834 = vpow2.f32 %v376_v4  ;;  %v368_v23 = vmul.f32 50.0, %v360_v5 }
  0xcd   :  { %1836 = vpow2.f32 %v628_v8  ;;  %v639_v27 = vmul.f32 %v1690_v10, %v1690_v10  ;;  %v512_v28 = vmul.f32 50.0, %v504_v15  ;;  %v361_v32 = vsub.f32 0.0, %v353_v24 }
  0xce   :  { %1838 = vpow2.f32 %v520_v14  ;;  %v752_v30 = vmul.f32 50.0, %v744_v20  ;;  %v737_v56 = vmul.f32 %v1708_v21, %v1708_v21  ;;  %v378_v31 = vmul.f32 1.442695, %v368_v23 }
  0xcf   :  { %1840 = vpow2.f32 %v760_v19  ;;  %v1645_v33 = vadd.f32 -0.9, %v2369_v41  ;;  %v647_v35 = vsub.f32 0.0, %v639_v27  ;;  %v1691_v36 = vadd.f32 0.3, %v2367_v37 }
  0xd0   :  { %856 = vmatmul.f32.gmra.mxu0 %v1811_v18  ;;  %v1829_v18 = vpop.eup %1828  ;;  %v522_v39 = vmul.f32 1.442695, %v512_v28  ;;  %v1669_v42 = vadd.f32 -0.3, %v2369_v41  ;;  %v762_v44 = vmul.f32 1.442695, %v752_v30  ;;  %1842 = vpow2.f32 %v378_v31 }
  0xd1   :  { %994 = vmatmul.f32.gmra.mxu2 %v1815_v26  ;;  %928 = vmatmul.f32.gmra.mxu1 %v1813_v22  ;;  %v1831_v22 = vpop.eup %1830  ;;  %v654_v26 = vmul.f32 50.0, %v646_v9  ;;  %v1709_v47 = vadd.f32 0.7, %v2369_v41  ;;  %v369_v49 = vmul.f32 50.0, %v361_v32  ;;  %v655_v52 = vmul.f32 50.0, %v647_v35 }
  0xd2   :  { %1048 = vmatmul.f32.gmra.mxu3 %v1817_v29  ;;  %v1833_v25 = vpop.eup %1832  ;;  %v497_v29 = vmul.f32 %v1668_v17, %v1668_v17  ;;  %v640_v53 = vmul.f32 %v1691_v36, %v1691_v36  ;;  %v498_v55 = vmul.f32 %v1669_v42, %v1669_v42  ;;  %v1646_v62 = vadd.f32 -0.9, %v2379_v16 }
  0xd3   :  { %v662_v34 = vmul.f32 1.442695, %v654_v26  ;;  %v1835_v38 = vpop.eup %1834  ;;  %v738_v58 = vmul.f32 %v1709_v47, %v1709_v47  ;;  %v380_v59 = vmul.f32 1.442695, %v369_v49  ;;  %v664_v63 = vmul.f32 1.442695, %v655_v52 }
  0xd4   :  { %v1837_v43 = vpop.eup %1836  ;;  %v648_v0 = vsub.f32 0.0, %v640_v53  ;;  %v1692_v1 = vadd.f32 0.3, %v2351_v6  ;;  %v506_v4 = vsub.f32 0.0, %v498_v55  ;;  %v1670_v5 = vadd.f32 -0.3, %v2379_v16 }
  0xd5   :  { %v1839_v48 = vpop.eup %1838  ;;  %1844 = vpow2.f32 %v662_v34  ;;  %v746_v9 = vsub.f32 0.0, %v738_v58  ;;  %v1710_v10 = vadd.f32 0.7, %v2379_v16  ;;  %v355_v15 = vmul.f32 %v1646_v62, %v1646_v62 }
  0xd6   :  { %v1841_v51 = vpop.eup %1840  ;;  %1846 = vpow2.f32 %v522_v39  ;;  %v641_v19 = vmul.f32 %v1692_v1, %v1692_v1  ;;  %v514_v20 = vmul.f32 50.0, %v506_v4  ;;  %v499_v21 = vmul.f32 %v1670_v5, %v1670_v5 }
  0xd7   :  { %1848 = vpow2.f32 %v762_v44  ;;  %v1843_v2 = vpop.eup %1842  ;;  %v739_v23 = vmul.f32 %v1710_v10, %v1710_v10  ;;  %v1647_v26 = vadd.f32 -0.9, %v2386_v46  ;;  %v1671_v32 = vadd.f32 -0.3, %v2386_v46 }
  0xd8   :  { %859 = vmatmul.f32.gmra.mxu0 %v1819_v40  ;;  %v505_v40 = vsub.f32 0.0, %v497_v29  ;;  %1850 = vpow2.f32 %v380_v59  ;;  %v649_v28 = vsub.f32 0.0, %v641_v19  ;;  %v1693_v29 = vadd.f32 0.3, %v2369_v41 }
  0xd9   :  { %997 = vmatmul.f32.gmra.mxu2 %v1823_v50  ;;  %931 = vmatmul.f32.gmra.mxu1 %v1821_v45  ;;  %v745_v45 = vsub.f32 0.0, %v737_v56  ;;  %v354_v50 = vmul.f32 %v1645_v33, %v1645_v33  ;;  %1852 = vpow2.f32 %v664_v63  ;;  %v526_v56 = vmul.f32 1.442695, %v514_v20 }
  0xda   :  { %1051 = vmatmul.f32.gmra.mxu3 %v1825_v54  ;;  %v513_v54 = vmul.f32 50.0, %v505_v40  ;;  %v507_v31 = vsub.f32 0.0, %v499_v21  ;;  %v747_v35 = vsub.f32 0.0, %v739_v23  ;;  %v1711_v36 = vadd.f32 0.7, %v2386_v46 }
  0xdb   :  { %v753_v57 = vmul.f32 50.0, %v745_v45  ;;  %v362_v60 = vsub.f32 0.0, %v354_v50  ;;  %v1845_v7 = vpop.eup %1844  ;;  %v356_v40 = vmul.f32 %v1647_v26, %v1647_v26  ;;  %v642_v44 = vmul.f32 %v1693_v29, %v1693_v29 }
  0xdc   :  { %v524_v3 = vmul.f32 1.442695, %v513_v54  ;;  %v515_v45 = vmul.f32 50.0, %v507_v31  ;;  %v500_v47 = vmul.f32 %v1671_v32, %v1671_v32  ;;  %v740_v49 = vmul.f32 %v1711_v36, %v1711_v36 }
  0xdd   :  { %v764_v8 = vmul.f32 1.442695, %v753_v57  ;;  %v370_v14 = vmul.f32 50.0, %v362_v60  ;;  %v1648_v52 = vadd.f32 -0.9, %v2357_v12  ;;  %v650_v54 = vsub.f32 0.0, %v642_v44 }
  0xde   :  { %1854 = vpow2.f32 %v524_v3  ;;  %v1694_v55 = vadd.f32 0.3, %v2379_v16  ;;  %v528_v58 = vmul.f32 1.442695, %v515_v45  ;;  %v508_v59 = vsub.f32 0.0, %v500_v47 }
  0xdf   :  { %1856 = vpow2.f32 %v764_v8  ;;  %v382_v24 = vmul.f32 1.442695, %v370_v14  ;;  %v1672_v60 = vadd.f32 -0.3, %v2357_v12  ;;  %v1712_v1 = vadd.f32 0.7, %v2357_v12 }
  0xe0   :  { %862 = vmatmul.f32.gmra.mxu0 %v1827_v13  ;;  %v1847_v13 = vpop.eup %1846  ;;  %v357_v4 = vmul.f32 %v1648_v52, %v1648_v52  ;;  %v643_v8 = vmul.f32 %v1694_v55, %v1694_v55  ;;  %v1695_v21 = vadd.f32 0.3, %v2386_v46  ;;  %v1713_v29 = vadd.f32 0.9, %v2346_v61 }
  0xe1   :  { %1000 = vmatmul.f32.gmra.mxu2 %v1829_v18  ;;  %934 = vmatmul.f32.gmra.mxu1 %v1831_v22  ;;  %v1849_v17 = vpop.eup %1848  ;;  %v656_v18 = vmul.f32 50.0, %v648_v0  ;;  %v754_v22 = vmul.f32 50.0, %v746_v9  ;;  %1858 = vpow2.f32 %v382_v24  ;;  %v748_v0 = vsub.f32 0.0, %v740_v49 }
  0xe2   :  { %1054 = vmatmul.f32.gmra.mxu3 %v1833_v25  ;;  %v363_v25 = vsub.f32 0.0, %v355_v15  ;;  %v1851_v30 = vpop.eup %1850  ;;  %v516_v9 = vmul.f32 50.0, %v508_v59  ;;  %v501_v10 = vmul.f32 %v1672_v60, %v1672_v60  ;;  %v741_v14 = vmul.f32 %v1712_v1, %v1712_v1 }
  0xe3   :  { %v666_v27 = vmul.f32 1.442695, %v656_v18  ;;  %v1853_v33 = vpop.eup %1852  ;;  %v766_v34 = vmul.f32 1.442695, %v754_v22  ;;  %v1649_v18 = vadd.f32 -0.7, %v2346_v61 }
  0xe4   :  { %v371_v39 = vmul.f32 50.0, %v363_v25  ;;  %v651_v20 = vsub.f32 0.0, %v643_v8  ;;  %v530_v23 = vmul.f32 1.442695, %v516_v9  ;;  %v509_v24 = vsub.f32 0.0, %v501_v10 }
  0xe5   :  { %1860 = vpow2.f32 %v666_v27  ;;  %v1673_v25 = vadd.f32 -0.1, %v2346_v61  ;;  %v398_v31 = vmul.f32 %v1649_v18, %v1649_v18  ;;  %v1696_v47 = vadd.f32 0.3, %v2357_v12 }
  0xe6   :  { %1862 = vpow2.f32 %v526_v56  ;;  %v384_v50 = vmul.f32 1.442695, %v371_v39  ;;  %v782_v39 = vmul.f32 %v1713_v29, %v1713_v29  ;;  %v1714_v55 = vadd.f32 0.9, %v2355_v11 }
  0xe7   :  { %1864 = vpow2.f32 %v766_v34  ;;  %v644_v34 = vmul.f32 %v1695_v21, %v1695_v21  ;;  %v542_v36 = vmul.f32 %v1673_v25, %v1673_v25  ;;  %v1697_v10 = vadd.f32 0.5, %v2346_v61 }
  0xe8   :  { %865 = vmatmul.f32.gmra.mxu0 %v1835_v38  ;;  %v1855_v38 = vpop.eup %1854  ;;  %1866 = vpow2.f32 %v384_v50  ;;  %v1715_v21 = vadd.f32 0.9, %v2367_v37 }
  0xe9   :  { %1003 = vmatmul.f32.gmra.mxu2 %v1837_v43  ;;  %937 = vmatmul.f32.gmra.mxu1 %v1839_v48  ;;  %v1857_v42 = vpop.eup %1856  ;;  %v657_v43 = vmul.f32 50.0, %v649_v28  ;;  %v755_v48 = vmul.f32 50.0, %v747_v35  ;;  %v749_v28 = vsub.f32 0.0, %v741_v14  ;;  %v517_v35 = vmul.f32 50.0, %v509_v24 }
  0xea   :  { %1057 = vmatmul.f32.gmra.mxu3 %v1841_v51  ;;  %v364_v51 = vsub.f32 0.0, %v356_v40  ;;  %v1859_v57 = vpop.eup %1858  ;;  %v652_v45 = vsub.f32 0.0, %v644_v34  ;;  %v550_v50 = vsub.f32 0.0, %v542_v36  ;;  %v1676_v36 = vadd.f32 -0.1, %v2351_v6 }
  0xeb   :  { %v668_v53 = vmul.f32 1.442695, %v657_v43  ;;  %v1861_v62 = vpop.eup %1860  ;;  %v768_v63 = vmul.f32 1.442695, %v755_v48  ;;  %v1650_v43 = vadd.f32 -0.7, %v2355_v11 }
  0xec   :  { %v372_v3 = vmul.f32 50.0, %v364_v51  ;;  %v532_v49 = vmul.f32 1.442695, %v517_v35  ;;  %v1674_v51 = vadd.f32 -0.1, %v2355_v11 }
  0xed   :  { %1868 = vpow2.f32 %v668_v53  ;;  %v399_v59 = vmul.f32 %v1650_v43, %v1650_v43 }
  0xee   :  { %1870 = vpow2.f32 %v528_v58  ;;  %v386_v15 = vmul.f32 1.442695, %v372_v3  ;;  %v543_v1 = vmul.f32 %v1674_v51, %v1674_v51  ;;  %v783_v3 = vmul.f32 %v1714_v55, %v1714_v55 }
  0xef   :  { %1872 = vpow2.f32 %v768_v63  ;;  %v645_v63 = vmul.f32 %v1696_v47, %v1696_v47 }
  0xf0   :  { %868 = vmatmul.f32.gmra.mxu0 %v1843_v2  ;;  %v1863_v2 = vpop.eup %1862  ;;  %1874 = vpow2.f32 %v386_v15  ;;  %v551_v15 = vsub.f32 0.0, %v543_v1  ;;  %v1677_v1 = vadd.f32 -0.1, %v2369_v41 }
  0xf1   :  { %1006 = vmatmul.f32.gmra.mxu2 %v1845_v7  ;;  %940 = vmatmul.f32.gmra.mxu1 %v1847_v13  ;;  %v1865_v5 = vpop.eup %1864  ;;  %v658_v7 = vmul.f32 50.0, %v650_v54  ;;  %v756_v13 = vmul.f32 50.0, %v748_v0  ;;  %v790_v54 = vsub.f32 0.0, %v782_v39  ;;  %v558_v0 = vmul.f32 50.0, %v550_v50 }
  0xf2   :  { %1060 = vmatmul.f32.gmra.mxu3 %v1849_v17  ;;  %v365_v17 = vsub.f32 0.0, %v357_v4  ;;  %v1867_v22 = vpop.eup %1866  ;;  %v653_v9 = vsub.f32 0.0, %v645_v63 }
  0xf3   :  { %v670_v19 = vmul.f32 1.442695, %v658_v7  ;;  %v1869_v26 = vpop.eup %1868  ;;  %v770_v27 = vmul.f32 1.442695, %v756_v13  ;;  %v1651_v7 = vadd.f32 -0.7, %v2367_v37 }
  0xf4   :  { %v373_v56 = vmul.f32 50.0, %v365_v17  ;;  %v566_v14 = vmul.f32 1.442695, %v558_v0  ;;  %v1675_v17 = vadd.f32 -0.1, %v2367_v37 }
  0xf5   :  { %1876 = vpow2.f32 %v670_v19  ;;  %v400_v24 = vmul.f32 %v1651_v7, %v1651_v7 }
  0xf6   :  { %1878 = vpow2.f32 %v530_v23  ;;  %v388_v40 = vmul.f32 1.442695, %v373_v56  ;;  %v544_v29 = vmul.f32 %v1675_v17, %v1675_v17  ;;  %v784_v56 = vmul.f32 %v1715_v21, %v1715_v21 }
  0xf7   :  { %1880 = vpow2.f32 %v770_v27  ;;  %v686_v27 = vmul.f32 %v1697_v10, %v1697_v10 }
  0xf8   :  { %871 = vmatmul.f32.gmra.mxu0 %v1851_v30  ;;  %v1871_v30 = vpop.eup %1870  ;;  %1882 = vpow2.f32 %v388_v40  ;;  %v552_v40 = vsub.f32 0.0, %v544_v29 }
  0xf9   :  { %1009 = vmatmul.f32.gmra.mxu2 %v1853_v33  ;;  %943 = vmatmul.f32.gmra.mxu1 %v1855_v38  ;;  %v1873_v32 = vpop.eup %1872  ;;  %v659_v33 = vmul.f32 50.0, %v651_v20  ;;  %v757_v38 = vmul.f32 50.0, %v749_v28  ;;  %v791_v20 = vsub.f32 0.0, %v783_v3  ;;  %v559_v28 = vmul.f32 50.0, %v551_v15 }
  0xfa   :  { %1063 = vmatmul.f32.gmra.mxu3 %v1857_v42  ;;  %v406_v42 = vsub.f32 0.0, %v398_v31  ;;  %v1875_v48 = vpop.eup %1874  ;;  %v694_v35 = vsub.f32 0.0, %v686_v27 }
  0xfb   :  { %v672_v44 = vmul.f32 1.442695, %v659_v33  ;;  %v1877_v52 = vpop.eup %1876  ;;  %v772_v53 = vmul.f32 1.442695, %v757_v38  ;;  %v1652_v33 = vadd.f32 -0.7, %v2351_v6 }
  0xfc   :  { %v414_v58 = vmul.f32 50.0, %v406_v42  ;;  %v568_v39 = vmul.f32 1.442695, %v559_v28  ;;  %v702_v51 = vmul.f32 50.0, %v694_v35  ;;  %v1654_v28 = vadd.f32 -0.7, %v2379_v16 }
  0xfd   :  { %1884 = vpow2.f32 %v672_v44  ;;  %v792_v44 = vsub.f32 0.0, %v784_v56  ;;  %v1718_v35 = vadd.f32 0.9, %v2379_v16 }
  0xfe   :  { %1886 = vpow2.f32 %v532_v49  ;;  %v422_v4 = vmul.f32 1.442695, %v414_v58  ;;  %v401_v49 = vmul.f32 %v1652_v33, %v1652_v33  ;;  %v710_v63 = vmul.f32 1.442695, %v702_v51 }
  0xff   :  { %1888 = vpow2.f32 %v772_v53  ;;  %v560_v53 = vmul.f32 50.0, %v552_v40  ;;  %v2471_v40 = vld [vmem:[%s2774_s5 + $0x8] sm:$0x7] }
 0x100   :  { %874 = vmatmul.f32.gmra.mxu0 %v1859_v57  ;;  %v1879_v57 = vpop.eup %1878  ;;  %1890 = vpow2.f32 %v422_v4  ;;  %v1717_v4 = vadd.f32 0.9, %v2369_v41 }
 0x101   :  { %1012 = vmatmul.f32.gmra.mxu2 %v1861_v62  ;;  %946 = vmatmul.f32.gmra.mxu1 %v1863_v2  ;;  %v1881_v60 = vpop.eup %1880  ;;  %v660_v62 = vmul.f32 50.0, %v652_v45  ;;  %v798_v2 = vmul.f32 50.0, %v790_v54  ;;  %v1716_v45 = vadd.f32 0.9, %v2351_v6  ;;  %v2448_v54 = vld [vmem:[%s2774_s5] sm:$0xff]  ;;  %v800_v6 = vmul.f32 50.0, %v792_v44 }
 0x102   :  { %1066 = vmatmul.f32.gmra.mxu3 %v1865_v5  ;;  %v407_v5 = vsub.f32 0.0, %v399_v59  ;;  %v1883_v13 = vpop.eup %1882  ;;  %v1109_v58 = vrot.slane %v2448_v54, 5  ;;  %v570_v3 = vmul.f32 1.442695, %v560_v53 }
 0x103   :  { %v674_v8 = vmul.f32 1.442695, %v660_v62  ;;  %v1885_v18 = vpop.eup %1884  ;;  %v806_v19 = vmul.f32 1.442695, %v798_v2  ;;  %v785_v55 = vmul.f32 %v1716_v45, %v1716_v45  ;;  %v1653_v62 = vadd.f32 -0.7, %v2369_v41 }
 0x104   :  { %v415_v23 = vmul.f32 50.0, %v407_v5  ;;  %v810_v7 = vmul.f32 1.442695, %v800_v6  ;;  %v2456_v10 = vperm.slane %v1109_v58, 0  ;;  %v1655_v6 = vadd.f32 -0.7, %v2386_v46 }
 0x105   :  { %1892 = vpow2.f32 %v674_v8  ;;  %v793_v8 = vsub.f32 0.0, %v785_v55 }
 0x106   :  { %1894 = vpow2.f32 %v566_v14  ;;  %v424_v37 = vmul.f32 1.442695, %v415_v23  ;;  %v402_v14 = vmul.f32 %v1653_v62, %v1653_v62 }
 0x107   :  { %1896 = vpow2.f32 %v806_v19  ;;  %v786_v19 = vmul.f32 %v1717_v4, %v1717_v4 }
 0x108   :  { %877 = vmatmul.f32.gmra.mxu0 %v1867_v22  ;;  %v1887_v22 = vpop.eup %1886  ;;  %1898 = vpow2.f32 %v424_v37 }
 0x109   :  { %1015 = vmatmul.f32.gmra.mxu2 %v1869_v26  ;;  %949 = vmatmul.f32.gmra.mxu1 %v1871_v30  ;;  %v1889_v25 = vpop.eup %1888  ;;  %v661_v26 = vmul.f32 50.0, %v653_v9  ;;  %v799_v30 = vmul.f32 50.0, %v791_v20  ;;  %v801_v20 = vmul.f32 50.0, %v793_v8  ;;  %v794_v37 = vsub.f32 0.0, %v786_v19 }
 0x10a   :  { %1069 = vmatmul.f32.gmra.mxu3 %v1873_v32  ;;  %v408_v32 = vsub.f32 0.0, %v400_v24  ;;  %v1891_v38 = vpop.eup %1890  ;;  %v410_v24 = vsub.f32 0.0, %v402_v14  ;;  %v404_v8 = vmul.f32 %v1655_v6, %v1655_v6 }
 0x10b   :  { %v676_v34 = vmul.f32 1.442695, %v661_v26  ;;  %v1893_v42 = vpop.eup %1892  ;;  %v808_v43 = vmul.f32 1.442695, %v799_v30  ;;  %v802_v44 = vmul.f32 50.0, %v794_v37 }
 0x10c   :  { %v1895_v47 = vpop.eup %1894 }
 0x10d   :  { %v1897_v50 = vpop.eup %1896  ;;  %1900 = vpow2.f32 %v676_v34  ;;  %v812_v34 = vmul.f32 1.442695, %v801_v20  ;;  %v1656_v20 = vadd.f32 -0.7, %v2357_v12 }
 0x10e   :  { %1902 = vpow2.f32 %v568_v39  ;;  %v1899_v2 = vpop.eup %1898 }
 0x10f   :  { %1904 = vpow2.f32 %v808_v43  ;;  %v403_v43 = vmul.f32 %v1654_v28, %v1654_v28 }
 0x110   :  { %880 = vmatmul.f32.gmra.mxu0 %v1875_v48  ;;  %v416_v48 = vmul.f32 50.0, %v408_v32  ;;  %v1678_v32 = vadd.f32 -0.1, %v2379_v16 }
 0x111   :  { %1018 = vmatmul.f32.gmra.mxu2 %v1877_v52  ;;  %952 = vmatmul.f32.gmra.mxu1 %v1879_v57  ;;  %v545_v52 = vmul.f32 %v1676_v36, %v1676_v36  ;;  %v411_v53 = vsub.f32 0.0, %v403_v43 }
 0x112   :  { %1072 = vmatmul.f32.gmra.mxu3 %v1881_v60  ;;  %v426_v59 = vmul.f32 1.442695, %v416_v48  ;;  %v409_v60 = vsub.f32 0.0, %v401_v49  ;;  %v547_v45 = vmul.f32 %v1678_v32, %v1678_v32  ;;  %v2476_v48 = vperm.slane %v2471_v40, 0 }
 0x113   :  { %v553_v0 = vsub.f32 0.0, %v545_v52  ;;  %v1901_v5 = vpop.eup %1900 }
 0x114   :  { %v1903_v9 = vpop.eup %1902  ;;  %1906 = vpow2.f32 %v426_v59  ;;  %2781 = vst [vmem:[#allocation3_spill] sm:$0xff] %v2476_v48  ;;  %v555_v62 = vsub.f32 0.0, %v547_v45  ;;  %v1657_v45 = vadd.f32 -0.5, %v2346_v61 }
 0x115   :  { %v1905_v15 = vpop.eup %1904  ;;  %1908 = vpow2.f32 %v710_v63  ;;  %v561_v17 = vmul.f32 50.0, %v553_v0  ;;  %v1679_v63 = vadd.f32 -0.1, %v2386_v46 }
 0x116   :  { %1910 = vpow2.f32 %v570_v3  ;;  %v1719_v3 = vadd.f32 0.9, %v2386_v46 }
 0x117   :  { %1912 = vpow2.f32 %v810_v7  ;;  %v572_v26 = vmul.f32 1.442695, %v561_v17  ;;  %v419_v7 = vmul.f32 50.0, %v411_v53 }
 0x118   :  { %883 = vmatmul.f32.gmra.mxu0 %v1883_v13  ;;  %v417_v13 = vmul.f32 50.0, %v409_v60  ;;  %v814_v60 = vmul.f32 1.442695, %v802_v44  ;;  %v788_v17 = vmul.f32 %v1719_v3, %v1719_v3 }
 0x119   :  { %1021 = vmatmul.f32.gmra.mxu2 %v1885_v18  ;;  %955 = vmatmul.f32.gmra.mxu1 %v1887_v22  ;;  %v546_v18 = vmul.f32 %v1677_v1, %v1677_v1  ;;  %v432_v46 = vmul.f32 1.442695, %v419_v7  ;;  %v1658_v7 = vadd.f32 -0.5, %v2355_v11 }
 0x11a   :  { %1075 = vmatmul.f32.gmra.mxu3 %v1889_v25  ;;  %v428_v23 = vmul.f32 1.442695, %v417_v13  ;;  %v1907_v29 = vpop.eup %1906  ;;  %v548_v13 = vmul.f32 %v1679_v63, %v1679_v63  ;;  %v446_v63 = vmul.f32 %v1657_v45, %v1657_v45 }
 0x11b   :  { %v554_v27 = vsub.f32 0.0, %v546_v18  ;;  %v1909_v33 = vpop.eup %1908 }
 0x11c   :  { %v1911_v36 = vpop.eup %1910 }
 0x11d   :  { %v2440_v31 = vpop.f32.mrf.mxu0  ;;  %v1913_v39 = vpop.eup %1912 }
 0x120   :  { %886 = vmatmul.f32.gmra.mxu0 %v1891_v38  ;;  %v418_v38 = vmul.f32 50.0, %v410_v24 }
 0x121   :  { %1024 = vmatmul.f32.gmra.mxu2 %v1893_v42  ;;  %958 = vmatmul.f32.gmra.mxu1 %v1895_v47  ;;  %v562_v42 = vmul.f32 50.0, %v554_v27  ;;  %v787_v47 = vmul.f32 %v1718_v35, %v1718_v35 }
 0x122   :  { %1078 = vmatmul.f32.gmra.mxu3 %v1897_v50  ;;  %v430_v49 = vmul.f32 1.442695, %v418_v38 }
 0x123   :  { %v574_v52 = vmul.f32 1.442695, %v562_v42 }
 0x125   :  { %v2450_v57 = vpop.f32.mrf.mxu0 }
 0x128   :  { %889 = vmatmul.f32.gmra.mxu0 %v1899_v2  ;;  %v795_v2 = vsub.f32 0.0, %v787_v47 }
 0x129   :  { %1027 = vmatmul.f32.gmra.mxu2 %v1901_v5  ;;  %961 = vmatmul.f32.gmra.mxu1 %v1903_v9  ;;  %v563_v9 = vmul.f32 50.0, %v555_v62 }
 0x12a   :  { %1081 = vmatmul.f32.gmra.mxu3 %v1905_v15  ;;  %v803_v15 = vmul.f32 50.0, %v795_v2 }
 0x12b   :  { %v576_v24 = vmul.f32 1.442695, %v563_v9 }
 0x12c   :  { %v980_v41 = vpop.f32.mrf.mxu2  ;;  %v816_v28 = vmul.f32 1.442695, %v803_v15 }
 0x12d   :  { %v1183_v21 = vmul.f32 %v2456_v10, %v980_v41  ;;  %v2459_v22 = vpop.f32.mrf.mxu3  ;;  %v2461_v25 = vpop.f32.mrf.mxu0  ;;  %v412_v41 = vsub.f32 0.0, %v404_v8 }
 0x12e   :  { %2780 = vst [vmem:[#allocation2_spill] sm:$0xff] %v2459_v22  ;;  %v2464_v56 = vpop.f32.mrf.mxu1 }
 0x12f   :  { %v1271_v30 = vmax.f32 %v1183_v21, 1e-10 }
 0x130   :  { %892 = vmatmul.f32.gmra.mxu0 %v1907_v29  ;;  %v796_v29 = vsub.f32 0.0, %v788_v17 }
 0x131   :  { %1914 = vlog2.f32 %v1271_v30  ;;  %1030 = vmatmul.f32.gmra.mxu2 %v1909_v33  ;;  %964 = vmatmul.f32.gmra.mxu1 %v1911_v36  ;;  %v1720_v30 = vadd.f32 0.9, %v2357_v12  ;;  %v420_v33 = vmul.f32 50.0, %v412_v41 }
 0x132   :  { %1916 = vpow2.f32 %v428_v23  ;;  %1084 = vmatmul.f32.gmra.mxu3 %v1913_v39  ;;  %v804_v38 = vmul.f32 50.0, %v796_v29 }
 0x133   :  { %1918 = vpow2.f32 %v572_v26  ;;  %v556_v26 = vsub.f32 0.0, %v548_v13  ;;  %v789_v39 = vmul.f32 %v1720_v30, %v1720_v30  ;;  %v434_v44 = vmul.f32 1.442695, %v420_v33 }
 0x134   :  { %v2473_v16 = vpop.f32.mrf.mxu2  ;;  %1920 = vpow2.f32 %v812_v34  ;;  %v405_v34 = vmul.f32 %v1656_v20, %v1656_v20  ;;  %v818_v53 = vmul.f32 1.442695, %v804_v38  ;;  %v447_v20 = vmul.f32 %v1658_v7, %v1658_v7 }
 0x135   :  { %v1037_v50 = vpop.f32.mrf.mxu3  ;;  %v2478_v51 = vpop.f32.mrf.mxu0  ;;  %1922 = vpow2.f32 %v430_v49  ;;  %v564_v35 = vmul.f32 50.0, %v556_v26  ;;  %v797_v6 = vsub.f32 0.0, %v789_v39 }
 0x136   :  { %v2482_v58 = vmul.f32 %v2476_v48, %v1037_v50  ;;  %v2484_v59 = vpop.f32.mrf.mxu1  ;;  %1924 = vpow2.f32 %v574_v52  ;;  %v413_v12 = vsub.f32 0.0, %v405_v34  ;;  %v455_v29 = vsub.f32 0.0, %v447_v20 }
 0x137   :  { %v1915_v55 = vpop.eup %1914  ;;  %1926 = vpow2.f32 %v814_v60  ;;  %v578_v50 = vmul.f32 1.442695, %v564_v35  ;;  %v805_v61 = vmul.f32 50.0, %v797_v6 }
 0x138   :  { %2782 = vst [vmem:[#allocation4_spill] sm:$0xff] %v2482_v58  ;;  %v1917_v0 = vpop.eup %1916  ;;  %v1407_v1 = vmul.f32 0.6931472, %v1915_v55  ;;  %1928 = vpow2.f32 %v432_v46  ;;  %v421_v62 = vmul.f32 50.0, %v413_v12 }
 0x139   :  { %v1919_v4 = vpop.eup %1918  ;;  %895 = vmatmul.f32.gmra.mxu0 %v1917_v0  ;;  %1930 = vpow2.f32 %v576_v24  ;;  %v820_v15 = vmul.f32 1.442695, %v805_v61 }
 0x13a   :  { %v1921_v5 = vpop.eup %1920  ;;  %967 = vmatmul.f32.gmra.mxu1 %v1919_v4  ;;  %1538 = vmatpush.msrb.mxu3 %v1407_v1  ;;  %1932 = vpow2.f32 %v816_v28  ;;  %v1107_v1 = vrot.slane %v2448_v54, 3  ;;  %v436_v4 = vmul.f32 1.442695, %v421_v62  ;;  %v1112_v62 = vrot.slane %v2471_v40, 1 }
 0x13b   :  { %1087 = vmatmul.f32.gmra.mxu3 %v1921_v5  ;;  %v1923_v27 = vpop.eup %1922  ;;  %1934 = vpow2.f32 %v434_v44  ;;  %v454_v5 = vsub.f32 0.0, %v446_v63  ;;  %v463_v44 = vmul.f32 50.0, %v455_v29 }
 0x13c   :  { %v2488_v14 = vpop.f32.mrf.mxu2  ;;  %v1925_v37 = vpop.eup %1924  ;;  %1936 = vpow2.f32 %v578_v50  ;;  %v2516_v46 = vperm.slane %v1107_v1, 0 }
 0x13d   :  { %v1040_v18 = vpop.f32.mrf.mxu3  ;;  %v2490_v19 = vpop.f32.mrf.mxu0  ;;  %1938 = vpow2.f32 %v818_v53  ;;  %v462_v41 = vmul.f32 50.0, %v454_v5  ;;  %v472_v6 = vmul.f32 1.442695, %v463_v44 }
 0x13e   :  { %v2494_v21 = vmul.f32 %v2476_v48, %v1040_v18  ;;  %v2496_v23 = vpop.f32.mrf.mxu1  ;;  %v1927_v32 = vpop.eup %1926  ;;  %1940 = vpow2.f32 %v436_v4  ;;  %v1163_v12 = vmul.f32 %v2516_v46, %v2484_v59  ;;  %v1162_v50 = vmul.f32 %v2516_v46, %v2464_v56 }
 0x13f   :  { %v1929_v52 = vpop.eup %1928  ;;  %1942 = vpow2.f32 %v820_v15  ;;  %v470_v28 = vmul.f32 1.442695, %v462_v41  ;;  %v1164_v38 = vmul.f32 %v2516_v46, %v2496_v23 }
 0x140   :  { %2783 = vst [vmem:[#allocation5_spill] sm:$0xff] %v2494_v21  ;;  %v1931_v55 = vpop.eup %1930  ;;  %v1250_v61 = vmax.f32 %v1162_v50, 1e-10 }
 0x141   :  { %898 = vmatmul.f32.gmra.mxu0 %v1923_v27  ;;  %v1933_v60 = vpop.eup %1932  ;;  %1944 = vpow2.f32 %v470_v28 }
 0x142   :  { %970 = vmatmul.f32.gmra.mxu1 %v1925_v37  ;;  %v1935_v13 = vpop.eup %1934 }
 0x143   :  { %1090 = vmatmul.f32.gmra.mxu3 %v1927_v32  ;;  %v1937_v17 = vpop.eup %1936 }
 0x144   :  { %v2499_v36 = vpop.f32.mrf.mxu2  ;;  %v1939_v18 = vpop.eup %1938 }
 0x145   :  { %v1043_v42 = vpop.f32.mrf.mxu3  ;;  %v2501_v43 = vpop.f32.mrf.mxu0 }
 0x146   :  { %v2505_v47 = vmul.f32 %v2476_v48, %v1043_v42  ;;  %v926_v49 = vpop.f32.mrf.mxu1  ;;  %v1941_v33 = vpop.eup %1940 }
 0x147   :  { %v1165_v30 = vmul.f32 %v2516_v46, %v926_v49  ;;  %v1943_v39 = vpop.eup %1942 }
 0x148   :  { %2784 = vst [vmem:[#allocation6_spill] sm:$0xff] %v2505_v47  ;;  %v1945_v63 = vpop.eup %1944 }
 0x149   :  { %901 = vmatmul.f32.gmra.mxu0 %v1929_v52  ;;  %v1253_v45 = vmax.f32 %v1165_v30, 1e-10  ;;  %v1252_v52 = vmax.f32 %v1164_v38, 1e-10 }
 0x14a   :  { %973 = vmatmul.f32.gmra.mxu1 %v1931_v55  ;;  %v1251_v55 = vmax.f32 %v1163_v12, 1e-10 }
 0x14b   :  { %1093 = vmatmul.f32.gmra.mxu3 %v1933_v60 }
 0x14c   :  { %v2507_v0 = vpop.f32.mrf.mxu2 }
 0x14d   :  { %v1046_v2 = vpop.f32.mrf.mxu3  ;;  %v2510_v3 = vpop.f32.mrf.mxu0 }
 0x14e   :  { %v2514_v8 = vmul.f32 %v2476_v48, %v1046_v2  ;;  %v929_v9 = vpop.f32.mrf.mxu1  ;;  %v2544_v2 = vperm.slane %v1112_v62, 0 }
 0x14f   :  { %v1166_v24 = vmul.f32 %v2516_v46, %v929_v9 }
 0x150   :  { %2785 = vst [vmem:[#allocation7_spill] sm:$0xff] %v2514_v8 }
 0x151   :  { %904 = vmatmul.f32.gmra.mxu0 %v1935_v13  ;;  %v1254_v34 = vmax.f32 %v1166_v24, 1e-10 }
 0x152   :  { %976 = vmatmul.f32.gmra.mxu1 %v1937_v17 }
 0x153   :  { %1096 = vmatmul.f32.gmra.mxu3 %v1939_v18  ;;  %1946 = vlog2.f32 %v1254_v34 }
 0x154   :  { %v2519_v26 = vpop.f32.mrf.mxu2 }
 0x155   :  { %v1049_v11 = vpop.f32.mrf.mxu3  ;;  %v2521_v27 = vpop.f32.mrf.mxu0 }
 0x156   :  { %v2525_v37 = vmul.f32 %v2476_v48, %v1049_v11  ;;  %v932_v32 = vpop.f32.mrf.mxu1 }
 0x157   :  { %v1167_v35 = vmul.f32 %v2516_v46, %v932_v32 }
 0x158   :  { %2786 = vst [vmem:[#allocation8_spill] sm:$0xff] %v2525_v37 }
 0x159   :  { %907 = vmatmul.f32.gmra.mxu0 %v1941_v33  ;;  %v1255_v42 = vmax.f32 %v1167_v35, 1e-10  ;;  %v1947_v56 = vpop.eup %1946 }
 0x15a   :  { %v1373_v9 = vmul.f32 0.6931472, %v1947_v56 }
 0x15b   :  { %1099 = vmatmul.f32.gmra.mxu3 %v1943_v39  ;;  %1948 = vlog2.f32 %v1255_v42 }
 0x15c   :  { %v2532_v49 = vpop.f32.mrf.mxu2  ;;  %1950 = vlog2.f32 %v1253_v45 }
 0x15d   :  { %v1052_v53 = vpop.f32.mrf.mxu3  ;;  %v2536_v23 = vpop.f32.mrf.mxu0  ;;  %1952 = vlog2.f32 %v1252_v52 }
 0x15e   :  { %v2539_v60 = vmul.f32 %v2476_v48, %v1052_v53  ;;  %v2541_v59 = vpop.f32.mrf.mxu1  ;;  %1954 = vpow2.f32 %v472_v6 }
 0x15f   :  { %1956 = vlog2.f32 %v1251_v55 }
 0x160   :  { %2787 = vst [vmem:[#allocation9_spill] sm:$0xff] %v2539_v60  ;;  %1958 = vlog2.f32 %v1250_v61 }
 0x161   :  { %910 = vmatmul.f32.gmra.mxu0 %v1945_v63  ;;  %v1949_v1 = vpop.eup %1948 }
 0x162   :  { %v1375_v4 = vmul.f32 0.6931472, %v1949_v1  ;;  %v1951_v7 = vpop.eup %1950 }
 0x163   :  { %v1953_v17 = vpop.eup %1952  ;;  %v1371_v24 = vmul.f32 0.6931472, %v1951_v7 }
 0x164   :  { %v2546_v5 = vpop.f32.mrf.mxu2  ;;  %1518 = vmatpush.msrb.mxu2 %v1375_v4  ;;  %v1955_v20 = vpop.eup %1954  ;;  %v1369_v28 = vmul.f32 0.6931472, %v1953_v17 }
 0x165   :  { %v1055_v13 = vpop.f32.mrf.mxu3  ;;  %v866_v15 = vpop.f32.mrf.mxu0 }
 0x166   :  { %v2549_v18 = vmul.f32 %v2544_v2, %v1055_v13  ;;  %v2551_v41 = vpop.f32.mrf.mxu1  ;;  %1519 = vmatpush.msrb.mxu2 %v1373_v9  ;;  %v1957_v11 = vpop.eup %1956  ;;  %v1105_v9 = vrot.slane %v2448_v54, 1 }
 0x167   :  { %v1959_v29 = vpop.eup %1958  ;;  %v1367_v30 = vmul.f32 0.6931472, %v1957_v11 }
 0x168   :  { %2788 = vst [vmem:[#allocation10_spill] sm:$0xff] %v2549_v18  ;;  %1520 = vmatpush.msrb.mxu2 %v1371_v24  ;;  %v1365_v33 = vmul.f32 0.6931472, %v1959_v29  ;;  %v1115_v11 = vperm.slane %v1105_v9, 0 }
 0x169   :  { %913 = vmatmul.f32.gmra.mxu0 %v1955_v20 }
 0x16a   :  { %1521 = vmatpush.msrb.mxu2 %v1369_v28 }
 0x16c   :  { %v2553_v32 = vpop.f32.mrf.mxu2  ;;  %1522 = vmatpush.msrb.mxu2 %v1367_v30 }
 0x16d   :  { %v1058_v34 = vpop.f32.mrf.mxu3  ;;  %v869_v35 = vpop.f32.mrf.mxu0 }
 0x16e   :  { %v2556_v38 = vmul.f32 %v2544_v2, %v1058_v34  ;;  %v2558_v39 = vpop.f32.mrf.mxu1  ;;  %1523 = vmatpush.msrb.mxu2 %v1365_v33  ;;  %v1146_v47 = vmul.f32 %v1115_v11, %v869_v35 }
 0x170   :  { %2789 = vst [vmem:[#allocation11_spill] sm:$0xff] %v2556_v38 }
 0x174   :  { %v2560_v42 = vpop.f32.mrf.mxu2 }
 0x175   :  { %v1061_v44 = vpop.f32.mrf.mxu3  ;;  %v872_v12 = vpop.f32.mrf.mxu0 }
 0x176   :  { %v2563_v45 = vmul.f32 %v2544_v2, %v1061_v44  ;;  %v2565_v50 = vpop.f32.mrf.mxu1 }
 0x178   :  { %2790 = vst [vmem:[#allocation12_spill] sm:$0xff] %v2563_v45 }
 0x17c   :  { %v2567_v52 = vpop.f32.mrf.mxu2 }
 0x17d   :  { %v1064_v53 = vpop.f32.mrf.mxu3  ;;  %v875_v6 = vpop.f32.mrf.mxu0 }
 0x17e   :  { %v2570_v55 = vmul.f32 %v2544_v2, %v1064_v53  ;;  %v2572_v62 = vpop.f32.mrf.mxu1  ;;  %v1148_v21 = vmul.f32 %v1115_v11, %v875_v6  ;;  %v1114_v6 = vperm.slane %v2448_v54, 0 }
 0x180   :  { %v1236_v9 = vmax.f32 %v1148_v21, 1e-10  ;;  %v1144_v21 = vmul.f32 %v1115_v11, %v2536_v23 }
 0x184   :  { %v2574_v63 = vpop.f32.mrf.mxu2 }
 0x185   :  { %v1067_v61 = vpop.f32.mrf.mxu3  ;;  %v878_v56 = vpop.f32.mrf.mxu0 }
 0x186   :  { %v2577_v1 = vmul.f32 %v2544_v2, %v1067_v61  ;;  %v2579_v4 = vpop.f32.mrf.mxu1  ;;  %v1149_v30 = vmul.f32 %v1115_v11, %v878_v56  ;;  %v1145_v56 = vmul.f32 %v1115_v11, %v866_v15 }
 0x188   :  { %v1237_v22 = vmax.f32 %v1149_v30, 1e-10  ;;  %v1233_v30 = vmax.f32 %v1145_v56, 1e-10 }
 0x18c   :  { %v2581_v7 = vpop.f32.mrf.mxu2 }
 0x18d   :  { %v1070_v13 = vpop.f32.mrf.mxu3  ;;  %v881_v17 = vpop.f32.mrf.mxu0 }
 0x18e   :  { %v2585_v20 = vmul.f32 %v2544_v2, %v1070_v13  ;;  %v2587_v24 = vpop.f32.mrf.mxu1  ;;  %v1150_v28 = vmul.f32 %v1115_v11, %v881_v17  ;;  %v1147_v13 = vmul.f32 %v1115_v11, %v872_v12  ;;  %v1113_v12 = vrot.slane %v2471_v40, 2 }
 0x190   :  { %v1238_v44 = vmax.f32 %v1150_v28, 1e-10  ;;  %v1235_v8 = vmax.f32 %v1147_v13, 1e-10  ;;  %v1142_v13 = vmul.f32 %v1114_v6, %v2510_v3 }
 0x192   :  { %1960 = vlog2.f32 %v1238_v44 }
 0x194   :  { %v2589_v29 = vpop.f32.mrf.mxu2 }
 0x195   :  { %v1073_v33 = vpop.f32.mrf.mxu3  ;;  %v884_v34 = vpop.f32.mrf.mxu0 }
 0x196   :  { %v2592_v53 = vmul.f32 %v2544_v2, %v1073_v33  ;;  %v1151_v61 = vmul.f32 %v1115_v11, %v884_v34  ;;  %v2594_v58 = vpop.f32.mrf.mxu1 }
 0x198   :  { %v1239_v48 = vmax.f32 %v1151_v61, 1e-10  ;;  %v1961_v35 = vpop.eup %1960  ;;  %v2609_v61 = vperm.slane %v1113_v12, 0 }
 0x199   :  { %v1341_v60 = vmul.f32 0.6931472, %v1961_v35 }
 0x19a   :  { %1962 = vlog2.f32 %v1239_v48  ;;  %v1234_v48 = vmax.f32 %v1146_v47, 1e-10  ;;  %v1141_v47 = vmul.f32 %v1114_v6, %v2501_v43 }
 0x19b   :  { %1964 = vlog2.f32 %v1237_v22  ;;  %v1143_v22 = vmul.f32 %v1114_v6, %v2521_v27 }
 0x19c   :  { %v2596_v17 = vpop.f32.mrf.mxu2  ;;  %1966 = vlog2.f32 %v1236_v9 }
 0x19d   :  { %v1076_v28 = vpop.f32.mrf.mxu3  ;;  %v2598_v37 = vpop.f32.mrf.mxu0  ;;  %1968 = vlog2.f32 %v1235_v8  ;;  %v1231_v11 = vmax.f32 %v1143_v22, 1e-10  ;;  %v1229_v22 = vmax.f32 %v1141_v47, 1e-10 }
 0x19e   :  { %v2601_v33 = vmul.f32 %v2544_v2, %v1076_v28  ;;  %v2603_v34 = vpop.f32.mrf.mxu1  ;;  %v1232_v28 = vmax.f32 %v1144_v21, 1e-10  ;;  %1970 = vlog2.f32 %v1234_v48  ;;  %v1140_v21 = vmul.f32 %v1114_v6, %v2490_v19 }
 0x19f   :  { %1972 = vlog2.f32 %v1233_v30  ;;  %v1230_v48 = vmax.f32 %v1142_v13, 1e-10  ;;  %v1111_v30 = vrot.slane %v2448_v54, 7 }
 0x1a0   :  { %v1963_v15 = vpop.eup %1962  ;;  %1974 = vlog2.f32 %v1232_v28  ;;  %v1137_v28 = vmul.f32 %v1114_v6, %v2450_v57 }
 0x1a1   :  { %v1343_v44 = vmul.f32 0.6931472, %v1963_v15  ;;  %v1965_v2 = vpop.eup %1964  ;;  %v1139_v15 = vmul.f32 %v1114_v6, %v2478_v51  ;;  %1976 = vlog2.f32 %v1231_v11 }
 0x1a2   :  { %v1967_v23 = vpop.eup %1966  ;;  %v1339_v8 = vmul.f32 0.6931472, %v1965_v2  ;;  %1978 = vlog2.f32 %v1230_v48 }
 0x1a3   :  { %1498 = vmatpush.msra.mxu1 %v1343_v44  ;;  %v1969_v3 = vpop.eup %1968  ;;  %v1337_v35 = vmul.f32 0.6931472, %v1967_v23  ;;  %v1227_v23 = vmax.f32 %v1139_v15, 1e-10  ;;  %1980 = vlog2.f32 %v1229_v22  ;;  %v1225_v15 = vmax.f32 %v1137_v28, 1e-10 }
 0x1a4   :  { %v1025_v40 = vpop.f32.mrf.mxu2  ;;  %v1971_v43 = vpop.eup %1970  ;;  %v1335_v44 = vmul.f32 0.6931472, %v1969_v3 }
 0x1a5   :  { %v1079_v9 = vpop.f32.mrf.mxu3  ;;  %v2613_v27 = vpop.f32.mrf.mxu0  ;;  %1499 = vmatpush.msra.mxu1 %v1341_v60  ;;  %v1228_v60 = vmax.f32 %v1140_v21, 1e-10  ;;  %v1333_v18 = vmul.f32 0.6931472, %v1971_v43  ;;  %v1136_v21 = vmul.f32 %v1114_v6, %v2440_v31 }
 0x1a6   :  { %v2616_v56 = vmul.f32 %v2609_v61, %v1079_v9  ;;  %v2618_v12 = vpop.f32.mrf.mxu1  ;;  %v1973_v2 = vpop.eup %1972  ;;  %v1138_v9 = vmul.f32 %v1114_v6, %v2461_v25 }
 0x1a7   :  { %1500 = vmatpush.msra.mxu1 %v1339_v8  ;;  %v1975_v13 = vpop.eup %1974  ;;  %v1331_v11 = vmul.f32 0.6931472, %v1973_v2  ;;  %v1121_v8 = vperm.slane %v1111_v30, 0  ;;  %1982 = vlog2.f32 %v1228_v60  ;;  %v1224_v2 = vmax.f32 %v1136_v21, 1e-10 }
 0x1a8   :  { %v1977_v25 = vpop.eup %1976  ;;  %v1226_v48 = vmax.f32 %v1138_v9, 1e-10  ;;  %1984 = vlog2.f32 %v1227_v23  ;;  %v1110_v21 = vrot.slane %v2448_v54, 6 }
 0x1a9   :  { %1501 = vmatpush.msra.mxu1 %v1337_v35  ;;  %v1329_v35 = vmul.f32 0.6931472, %v1975_v13  ;;  %v1979_v57 = vpop.eup %1978  ;;  %v1327_v22 = vmul.f32 0.6931472, %v1977_v25 }
 0x1aa   :  { %v1981_v38 = vpop.eup %1980  ;;  %1986 = vlog2.f32 %v1226_v48  ;;  %v1325_v30 = vmul.f32 0.6931472, %v1979_v57  ;;  %v1193_v57 = vmul.f32 %v1121_v8, %v2567_v52 }
 0x1ab   :  { %1502 = vmatpush.msra.mxu1 %v1335_v44  ;;  %v1198_v44 = vmul.f32 %v1121_v8, %v1025_v40  ;;  %1988 = vlog2.f32 %v1225_v15  ;;  %v1323_v60 = vmul.f32 0.6931472, %v1981_v38  ;;  %v1194_v38 = vmul.f32 %v1121_v8, %v2574_v63 }
 0x1ac   :  { %v1028_v19 = vpop.f32.mrf.mxu2  ;;  %1990 = vlog2.f32 %v1224_v2 }
 0x1ad   :  { %v2625_v51 = vpop.f32.mrf.mxu3  ;;  %v2627_v47 = vpop.f32.mrf.mxu0  ;;  %1503 = vmatpush.msra.mxu1 %v1333_v18  ;;  %v1199_v43 = vmul.f32 %v1121_v8, %v1028_v19  ;;  %v1197_v18 = vmul.f32 %v1121_v8, %v2596_v17  ;;  %v1196_v19 = vmul.f32 %v1121_v8, %v2589_v29  ;;  %v1286_v13 = vmax.f32 %v1198_v44, 1e-10 }
 0x1ae   :  { %v2629_v3 = vpop.f32.mrf.mxu1  ;;  %v1983_v31 = vpop.eup %1982  ;;  %v1195_v17 = vmul.f32 %v1121_v8, %v2581_v7  ;;  %v1282_v63 = vmax.f32 %v1194_v38, 1e-10 }
 0x1af   :  { %1504 = vmatpush.msra.mxu1 %v1331_v11  ;;  %v1287_v45 = vmax.f32 %v1199_v43, 1e-10  ;;  %v1985_v28 = vpop.eup %1984  ;;  %v1321_v23 = vmul.f32 0.6931472, %v1983_v31  ;;  %v1285_v11 = vmax.f32 %v1197_v18, 1e-10 }
 0x1b0   :  { %v1987_v25 = vpop.eup %1986  ;;  %v1319_v48 = vmul.f32 0.6931472, %v1985_v28  ;;  %v1283_v15 = vmax.f32 %v1195_v17, 1e-10 }
 0x1b1   :  { %1505 = vmatpush.msra.mxu1 %v1329_v35  ;;  %1992 = vlog2.f32 %v1287_v45  ;;  %v1284_v35 = vmax.f32 %v1196_v19, 1e-10  ;;  %v1989_v29 = vpop.eup %1988  ;;  %v1317_v43 = vmul.f32 0.6931472, %v1987_v25  ;;  %v1281_v19 = vmax.f32 %v1193_v57, 1e-10 }
 0x1b2   :  { %1994 = vlog2.f32 %v1286_v13  ;;  %v1991_v7 = vpop.eup %1990  ;;  %v1315_v31 = vmul.f32 0.6931472, %v1989_v29 }
 0x1b3   :  { %1506 = vmatpush.msra.mxu1 %v1327_v22  ;;  %1996 = vlog2.f32 %v1285_v11  ;;  %v1120_v22 = vperm.slane %v1110_v21, 0  ;;  %v1313_v13 = vmul.f32 0.6931472, %v1991_v7 }
 0x1b4   :  { %1998 = vlog2.f32 %v1284_v35 }
 0x1b5   :  { %v2633_v6 = vpop.f32.mrf.mxu3  ;;  %1507 = vmatpush.msra.mxu1 %v1325_v30  ;;  %v1192_v30 = vmul.f32 %v1121_v8, %v2560_v42  ;;  %v1191_v52 = vmul.f32 %v1120_v22, %v2553_v32  ;;  %2000 = vlog2.f32 %v1283_v15  ;;  %v1190_v17 = vmul.f32 %v1120_v22, %v2546_v5 }
 0x1b6   :  { %v2635_v9 = vpop.f32.mrf.mxu0  ;;  %2002 = vlog2.f32 %v1282_v63  ;;  %v1189_v25 = vmul.f32 %v1120_v22, %v2532_v49  ;;  %v1188_v35 = vmul.f32 %v1120_v22, %v2519_v26  ;;  %v1187_v7 = vmul.f32 %v1120_v22, %v2507_v0 }
 0x1b7   :  { %v2638_v40 = vpop.f32.mrf.mxu1  ;;  %1508 = vmatpush.msra.mxu1 %v1323_v60  ;;  %v1993_v2 = vpop.eup %1992  ;;  %v1280_v11 = vmax.f32 %v1192_v30, 1e-10  ;;  %v1279_v21 = vmax.f32 %v1191_v52, 1e-10  ;;  %2004 = vlog2.f32 %v1281_v19  ;;  %v1278_v29 = vmax.f32 %v1190_v17, 1e-10 }
 0x1b8   :  { %v1995_v60 = vpop.eup %1994  ;;  %v1439_v28 = vmul.f32 0.6931472, %v1993_v2  ;;  %v1277_v49 = vmax.f32 %v1189_v25, 1e-10  ;;  %v1185_v2 = vmul.f32 %v1120_v22, %v2488_v14  ;;  %v1276_v26 = vmax.f32 %v1188_v35, 1e-10 }
 0x1b9   :  { %1509 = vmatpush.msra.mxu1 %v1321_v23  ;;  %v1997_v23 = vpop.eup %1996  ;;  %v1437_v42 = vmul.f32 0.6931472, %v1995_v60  ;;  %2006 = vlog2.f32 %v1280_v11  ;;  %v1184_v0 = vmul.f32 %v1120_v22, %v2473_v16  ;;  %v1179_v16 = vmul.f32 %v2456_v10, %v2638_v40 }
 0x1ba   :  { %v1999_v8 = vpop.eup %1998  ;;  %2008 = vlog2.f32 %v1279_v21  ;;  %v1177_v40 = vmul.f32 %v2456_v10, %v2618_v12 }
 0x1bb   :  { %1510 = vmatpush.msra.mxu1 %v1319_v48  ;;  %v1435_v48 = vmul.f32 0.6931472, %v1997_v23  ;;  %v2001_v38 = vpop.eup %2000  ;;  %v1433_v57 = vmul.f32 0.6931472, %v1999_v8  ;;  %2010 = vlog2.f32 %v1278_v29 }
 0x1bc   :  { %v2003_v15 = vpop.eup %2002  ;;  %v1431_v30 = vmul.f32 0.6931472, %v2001_v38  ;;  %2012 = vlog2.f32 %v1277_v49  ;;  %v1272_v38 = vmax.f32 %v1184_v0, 1e-10 }
 0x1bd   :  { %1511 = vmatpush.msra.mxu1 %v1317_v43  ;;  %v2005_v63 = vpop.eup %2004  ;;  %v1429_v60 = vmul.f32 0.6931472, %v2003_v15  ;;  %2014 = vlog2.f32 %v1276_v26 }
 0x1be   :  { %v2644_v45 = vpop.f32.mrf.mxu3  ;;  %v2646_v44 = vpop.f32.mrf.mxu0  ;;  %v1427_v23 = vmul.f32 0.6931472, %v2005_v63 }
 0x1bf   :  { %v971_v18 = vpop.f32.mrf.mxu1  ;;  %1512 = vmatpush.msra.mxu1 %v1315_v31  ;;  %v1186_v31 = vmul.f32 %v1120_v22, %v2499_v36  ;;  %v2007_v19 = vpop.eup %2006 }
 0x1c0   :  { %v2009_v17 = vpop.eup %2008  ;;  %v1180_v36 = vmul.f32 %v2456_v10, %v971_v18  ;;  %v1425_v8 = vmul.f32 0.6931472, %v2007_v19  ;;  %v1108_v18 = vrot.slane %v2448_v54, 4 }
 0x1c1   :  { %1513 = vmatpush.msra.mxu1 %v1313_v13  ;;  %v1275_v13 = vmax.f32 %v1187_v7, 1e-10  ;;  %v1274_v11 = vmax.f32 %v1186_v31, 1e-10  ;;  %v1423_v35 = vmul.f32 0.6931472, %v2009_v17 }
 0x1c2   :  { %v1268_v15 = vmax.f32 %v1180_v36, 1e-10  ;;  %v1118_v54 = vperm.slane %v1108_v18, 0 }
 0x1c3   :  { %1558 = vmatpush.msrb.mxu1 %v1439_v28  ;;  %v1273_v28 = vmax.f32 %v1185_v2, 1e-10  ;;  %2016 = vlog2.f32 %v1275_v13  ;;  %v1267_v2 = vmax.f32 %v1179_v16, 1e-10  ;;  %v1265_v13 = vmax.f32 %v1177_v40, 1e-10 }
 0x1c4   :  { %v1175_v12 = vmul.f32 %v1118_v54, %v2594_v58  ;;  %v1174_v17 = vmul.f32 %v1118_v54, %v2587_v24 }
 0x1c5   :  { %1559 = vmatpush.msrb.mxu1 %v1437_v42  ;;  %2018 = vlog2.f32 %v1273_v28 }
 0x1c6   :  { %v2652_v32 = vpop.f32.mrf.mxu0  ;;  %v2655_v5 = vpop.f32.mrf.mxu3  ;;  %2020 = vlog2.f32 %v1274_v11  ;;  %v1263_v58 = vmax.f32 %v1175_v12, 1e-10 }
 0x1c7   :  { %v974_v43 = vpop.f32.mrf.mxu1  ;;  %1560 = vmatpush.msrb.mxu1 %v1435_v48  ;;  %v2011_v48 = vpop.eup %2010 }
 0x1c8   :  { %v1181_v52 = vmul.f32 %v2456_v10, %v974_v43  ;;  %v2013_v43 = vpop.eup %2012  ;;  %v1421_v7 = vmul.f32 0.6931472, %v2011_v48  ;;  %v1168_v48 = vmul.f32 %v1118_v54, %v2541_v59 }
 0x1c9   :  { %1561 = vmatpush.msrb.mxu1 %v1433_v57  ;;  %v1178_v57 = vmul.f32 %v2456_v10, %v2629_v3  ;;  %v2015_v49 = vpop.eup %2014  ;;  %v1176_v3 = vmul.f32 %v2456_v10, %v2603_v34 }
 0x1ca   :  { %v1269_v25 = vmax.f32 %v1181_v52, 1e-10  ;;  %v2017_v31 = vpop.eup %2016  ;;  %v1417_v52 = vmul.f32 0.6931472, %v2015_v49  ;;  %v1256_v40 = vmax.f32 %v1168_v48, 1e-10 }
 0x1cb   :  { %1562 = vmatpush.msrb.mxu1 %v1431_v30  ;;  %v1419_v30 = vmul.f32 0.6931472, %v2013_v43  ;;  %v1266_v26 = vmax.f32 %v1178_v57, 1e-10  ;;  %v1415_v28 = vmul.f32 0.6931472, %v2017_v31  ;;  %v1171_v57 = vmul.f32 %v1118_v54, %v2565_v50 }
 0x1cc   :  { %2022 = vlog2.f32 %v1269_v25  ;;  %v1264_v11 = vmax.f32 %v1176_v3, 1e-10  ;;  %v1173_v25 = vmul.f32 %v1118_v54, %v2579_v4  ;;  %v2122_v43 = vld [vmem:[%s2774_s5] sm:$0xff]  ;;  %v1169_v50 = vmul.f32 %v1118_v54, %v2551_v41 }
 0x1cd   :  { %1563 = vmatpush.msrb.mxu1 %v1429_v60  ;;  %v2019_v60 = vpop.eup %2018  ;;  %v1106_v18 = vrot.slane %v2122_v43, 2 }
 0x1ce   :  { %v2662_v14 = vpop.f32.mrf.mxu0  ;;  %v2668_v22 = vpop.f32.mrf.mxu3  ;;  %v1261_v49 = vmax.f32 %v1173_v25, 1e-10 }
 0x1cf   :  { %v977_v42 = vpop.f32.mrf.mxu1  ;;  %1564 = vmatpush.msrb.mxu1 %v1427_v23  ;;  %v2021_v19 = vpop.eup %2020  ;;  %v2692_v3 = vperm.slane %v1106_v18, 0 }
 0x1d0   :  { %v1182_v21 = vmul.f32 %v2456_v10, %v977_v42  ;;  %v1413_v34 = vmul.f32 0.6931472, %v2021_v19 }
 0x1d1   :  { %1565 = vmatpush.msrb.mxu1 %v1425_v8  ;;  %v1158_v41 = vmul.f32 %v2692_v3, %v2662_v14 }
 0x1d2   :  { %v1270_v29 = vmax.f32 %v1182_v21, 1e-10  ;;  %v2023_v0 = vpop.eup %2022  ;;  %v1411_v21 = vmul.f32 0.6931472, %v2019_v60 }
 0x1d3   :  { %1566 = vmatpush.msrb.mxu1 %v1423_v35  ;;  %v1403_v16 = vmul.f32 0.6931472, %v2023_v0  ;;  %v1172_v35 = vmul.f32 %v1118_v54, %v2572_v62  ;;  %v1246_v48 = vmax.f32 %v1158_v41, 1e-10 }
 0x1d4   :  { %2024 = vlog2.f32 %v1270_v29  ;;  %v1262_v29 = vmax.f32 %v1174_v17, 1e-10  ;;  %v1257_v17 = vmax.f32 %v1169_v50, 1e-10 }
 0x1d5   :  { %2026 = vlog2.f32 %v1272_v38  ;;  %1567 = vmatpush.msrb.mxu1 %v1421_v7  ;;  %v1170_v7 = vmul.f32 %v1118_v54, %v2558_v39  ;;  %v1260_v31 = vmax.f32 %v1172_v35, 1e-10 }
 0x1d6   :  { %v2675_v63 = vpop.f32.mrf.mxu0  ;;  %2028 = vlog2.f32 %v1268_v15  ;;  %v2681_v36 = vpop.f32.mrf.mxu3 }
 0x1d7   :  { %1568 = vmatpush.msrb.mxu1 %v1419_v30  ;;  %2030 = vlog2.f32 %v1267_v2  ;;  %v1258_v39 = vmax.f32 %v1170_v7, 1e-10  ;;  %v1159_v19 = vmul.f32 %v2692_v3, %v2675_v63  ;;  %v1222_v14 = vmul.f32 %v2609_v61, %v2681_v36 }
 0x1d8   :  { %2032 = vlog2.f32 %v1266_v26  ;;  %v1259_v26 = vmax.f32 %v1171_v57, 1e-10  ;;  %v1155_v36 = vmul.f32 %v2692_v3, %v2635_v9  ;;  %v1219_v9 = vmul.f32 %v2609_v61, %v2644_v45 }
 0x1d9   :  { %1569 = vmatpush.msrb.mxu1 %v1417_v52  ;;  %2034 = vlog2.f32 %v1265_v13  ;;  %v1310_v18 = vmax.f32 %v1222_v14, 1e-10  ;;  %v1301_v14 = vmax.f32 %v2585_v20, 1e-10 }
 0x1da   :  { %v2025_v23 = vpop.eup %2024  ;;  %2036 = vlog2.f32 %v1264_v11 }
 0x1db   :  { %v2027_v10 = vpop.eup %2026  ;;  %v1405_v42 = vmul.f32 0.6931472, %v2025_v23  ;;  %1570 = vmatpush.msrb.mxu1 %v1415_v28  ;;  %2038 = vlog2.f32 %v1263_v58  ;;  %v1303_v58 = vmax.f32 %v2601_v33, 1e-10 }
 0x1dc   :  { %v2029_v8 = vpop.eup %2028  ;;  %v1409_v4 = vmul.f32 0.6931472, %v2027_v10  ;;  %2040 = vlog2.f32 %v1262_v29 }
 0x1dd   :  { %1539 = vmatpush.msrb.mxu3 %v1405_v42  ;;  %1571 = vmatpush.msrb.mxu1 %v1413_v34  ;;  %v2031_v38 = vpop.eup %2030  ;;  %v1401_v15 = vmul.f32 0.6931472, %v2029_v8  ;;  %2042 = vlog2.f32 %v1261_v49  ;;  %v1157_v34 = vmul.f32 %v2692_v3, %v2652_v32  ;;  %v1247_v42 = vmax.f32 %v1159_v19, 1e-10 }
 0x1de   :  { %v911_v24 = vpop.f32.mrf.mxu0  ;;  %v2033_v59 = vpop.eup %2032  ;;  %v1399_v62 = vmul.f32 0.6931472, %v2031_v38  ;;  %2044 = vlog2.f32 %v1256_v40  ;;  %v1221_v32 = vmul.f32 %v2609_v61, %v2668_v22  ;;  %v1154_v22 = vmul.f32 %v2692_v3, %v2627_v47 }
 0x1df   :  { %1540 = vmatpush.msrb.mxu3 %v1403_v16  ;;  %1572 = vmatpush.msrb.mxu1 %v1411_v21  ;;  %v1160_v2 = vmul.f32 %v2516_v46, %v911_v24  ;;  %v2035_v30 = vpop.eup %2034  ;;  %v1397_v60 = vmul.f32 0.6931472, %v2033_v59  ;;  %v1100_v12 = vpop.f32.mrf.mxu3  ;;  %2046 = vlog2.f32 %v1260_v31  ;;  %v1156_v21 = vmul.f32 %v2692_v3, %v2646_v44 }
 0x1e0   :  { %v2037_v52 = vpop.eup %2036  ;;  %v1395_v13 = vmul.f32 0.6931472, %v2035_v30  ;;  %2048 = vlog2.f32 %v1259_v26  ;;  %v1223_v10 = vmul.f32 %v2609_v61, %v1100_v12  ;;  %v1245_v35 = vmax.f32 %v1157_v34, 1e-10 }
 0x1e1   :  { %1541 = vmatpush.msrb.mxu3 %v1401_v15  ;;  %1573 = vmatpush.msrb.mxu1 %v1409_v4  ;;  %v1248_v0 = vmax.f32 %v1160_v2, 1e-10  ;;  %v2039_v23 = vpop.eup %2038  ;;  %v1393_v11 = vmul.f32 0.6931472, %v2037_v52  ;;  %2050 = vlog2.f32 %v1258_v39  ;;  %v1220_v44 = vmul.f32 %v2609_v61, %v2655_v5 }
 0x1e2   :  { %v2041_v63 = vpop.eup %2040  ;;  %v1391_v25 = vmul.f32 0.6931472, %v2039_v23  ;;  %v1311_v38 = vmax.f32 %v1223_v10, 1e-10  ;;  %v1244_v57 = vmax.f32 %v1156_v21, 1e-10  ;;  %v1153_v5 = vmul.f32 %v2692_v3, %v2613_v27 }
 0x1e3   :  { %1542 = vmatpush.msrb.mxu3 %v1399_v62  ;;  %2052 = vlog2.f32 %v1248_v0  ;;  %v1389_v24 = vmul.f32 0.6931472, %v2041_v63  ;;  %v1309_v7 = vmax.f32 %v1221_v32, 1e-10  ;;  %v1243_v62 = vmax.f32 %v1155_v36, 1e-10 }
 0x1e4   :  { %v1218_v47 = vmul.f32 %v2609_v61, %v2633_v6  ;;  %v1308_v30 = vmax.f32 %v1220_v44, 1e-10  ;;  %v1152_v26 = vmul.f32 %v2692_v3, %v2598_v37  ;;  %v1217_v27 = vmul.f32 %v2609_v61, %v2625_v51 }
 0x1e5   :  { %1543 = vmatpush.msrb.mxu3 %v1397_v60  ;;  %v1242_v60 = vmax.f32 %v1154_v22, 1e-10  ;;  %v1307_v39 = vmax.f32 %v1219_v9, 1e-10  ;;  %v1241_v12 = vmax.f32 %v1153_v5, 1e-10 }
 0x1e6   :  { %v914_v28 = vpop.f32.mrf.mxu0  ;;  %v1240_v23 = vmax.f32 %v1152_v26, 1e-10  ;;  %v1305_v51 = vmax.f32 %v1217_v27, 1e-10  ;;  %v1304_v34 = vmax.f32 %v2616_v56, 1e-10 }
 0x1e7   :  { %v1161_v54 = vmul.f32 %v2516_v46, %v914_v28  ;;  %1544 = vmatpush.msrb.mxu3 %v1395_v13  ;;  %v2043_v46 = vpop.eup %2042  ;;  %v1306_v28 = vmax.f32 %v1218_v47, 1e-10  ;;  %v1300_v56 = vmax.f32 %v2577_v1, 1e-10 }
 0x1e8   :  { %v2045_v16 = vpop.eup %2044  ;;  %v1387_v43 = vmul.f32 0.6931472, %v2043_v46 }
 0x1e9   :  { %v1249_v8 = vmax.f32 %v1161_v54, 1e-10  ;;  %1545 = vmatpush.msrb.mxu3 %v1393_v11  ;;  %v2047_v33 = vpop.eup %2046  ;;  %v1377_v61 = vmul.f32 0.6931472, %v2045_v16  ;;  %v1302_v11 = vmax.f32 %v2592_v53, 1e-10 }
 0x1ea   :  { %v2049_v29 = vpop.eup %2048  ;;  %v1385_v59 = vmul.f32 0.6931472, %v2047_v33  ;;  %v1299_v33 = vmax.f32 %v2570_v55, 1e-10 }
 0x1eb   :  { %2054 = vlog2.f32 %v1249_v8  ;;  %1546 = vmatpush.msrb.mxu3 %v1391_v25  ;;  %v2051_v4 = vpop.eup %2050  ;;  %v1383_v40 = vmul.f32 0.6931472, %v2049_v29 }
 0x1ec   :  { %2056 = vlog2.f32 %v1257_v17  ;;  %v2053_v15 = vpop.eup %2052  ;;  %v1381_v45 = vmul.f32 0.6931472, %v2051_v4 }
 0x1ed   :  { %2058 = vlog2.f32 %v1247_v42  ;;  %1547 = vmatpush.msrb.mxu3 %v1389_v24  ;;  %v1361_v19 = vmul.f32 0.6931472, %v2053_v15 }
 0x1ee   :  { %2060 = vlog2.f32 %v1303_v58 }
 0x1ef   :  { %2062 = vlog2.f32 %v1246_v48  ;;  %1548 = vmatpush.msrb.mxu3 %v1387_v43  ;;  %v2791_v43 = vld [vmem:[#allocation12_spill] sm:$0xff] }
 0x1f0   :  { %2064 = vlog2.f32 %v1311_v38  ;;  %v1298_v44 = vmax.f32 %v2791_v43, 1e-10 }
 0x1f1   :  { %v2055_v49 = vpop.eup %2054  ;;  %2066 = vlog2.f32 %v1245_v35  ;;  %1549 = vmatpush.msrb.mxu3 %v1385_v59 }
 0x1f2   :  { %v2057_v2 = vpop.eup %2056  ;;  %2068 = vlog2.f32 %v1310_v18  ;;  %v1363_v31 = vmul.f32 0.6931472, %v2055_v49  ;;  %v1490_v49 = vld [vmem:[%s2775_s6 + $0x10] sm:$0xff] }
 0x1f3   :  { %v2059_v50 = vpop.eup %2058  ;;  %2070 = vlog2.f32 %v1244_v57  ;;  %1550 = vmatpush.msrb.mxu3 %v1383_v40  ;;  %v1379_v0 = vmul.f32 0.6931472, %v2057_v2  ;;  %v2792_v57 = vld [vmem:[#allocation11_spill] sm:$0xff]  ;;  %v1488_v40 = vld [vmem:[%s2775_s6] sm:$0xff] }
 0x1f4   :  { %v2724_v52 = vpop.eup %2060  ;;  %2072 = vlog2.f32 %v1309_v7  ;;  %1524 = vmatpush.msrb.mxu2 %v1363_v31  ;;  %v1359_v37 = vmul.f32 0.6931472, %v2059_v50  ;;  %v1297_v15 = vmax.f32 %v2792_v57, 1e-10  ;;  %v1489_v7 = vld [vmem:[%s2775_s6 + $0x8] sm:$0xff]  ;;  %v2794_v50 = vld [vmem:[#allocation9_spill] sm:$0xff]  ;;  %1514 = vmatmul.f32.vlgmr.msra.gmra.mxu1 %v1488_v40 }
 0x1f5   :  { %v2063_v6 = vpop.eup %2062  ;;  %2074 = vlog2.f32 %v1243_v62  ;;  %1551 = vmatpush.msrb.mxu3 %v1381_v45  ;;  %v1471_v55 = vmul.f32 0.6931472, %v2724_v52  ;;  %v2793_v62 = vld [vmem:[#allocation10_spill] sm:$0xff]  ;;  %v1295_v45 = vmax.f32 %v2794_v50, 1e-10  ;;  %v2795_v52 = vld [vmem:[#allocation8_spill] sm:$0xff] }
 0x1f6   :  { %v2065_v13 = vpop.eup %2064  ;;  %2076 = vlog2.f32 %v1308_v30  ;;  %1525 = vmatpush.msrb.mxu2 %v1361_v19  ;;  %v1357_v54 = vmul.f32 0.6931472, %v2063_v6  ;;  %v1296_v2 = vmax.f32 %v2793_v62, 1e-10  ;;  %v1294_v27 = vmax.f32 %v2795_v52, 1e-10 }
 0x1f7   :  { %v2067_v3 = vpop.eup %2066  ;;  %2078 = vlog2.f32 %v1242_v60  ;;  %1552 = vmatpush.msrb.mxu3 %v1379_v0  ;;  %v1487_v10 = vmul.f32 0.6931472, %v2065_v13  ;;  %v1493_v19 = vld [vmem:[%s2775_s6 + $0x28] sm:$0xff] }
 0x1f8   :  { %v2069_v41 = vpop.eup %2068  ;;  %2080 = vlog2.f32 %v1307_v39  ;;  %1526 = vmatpush.msrb.mxu2 %v1359_v37  ;;  %v1355_v42 = vmul.f32 0.6931472, %v2067_v3  ;;  %v2797_v3 = vld [vmem:[#allocation6_spill] sm:$0xff] }
 0x1f9   :  { %v2071_v17 = vpop.eup %2070  ;;  %2082 = vlog2.f32 %v1241_v12  ;;  %1553 = vmatpush.msrb.mxu3 %v1377_v61  ;;  %v1485_v25 = vmul.f32 0.6931472, %v2069_v41  ;;  %v2796_v12 = vld [vmem:[#allocation7_spill] sm:$0xff]  ;;  %v1031_v61 = vpop.f32.mrf.mxu2 }
 0x1fa   :  { %v2073_v63 = vpop.eup %2072  ;;  %2084 = vlog2.f32 %v1306_v28  ;;  %1527 = vmatpush.msrb.mxu2 %v1357_v54  ;;  %v1353_v46 = vmul.f32 0.6931472, %v2071_v17  ;;  %1554 = vmatmul.f32.vlgmr.msrb.gmra.mxu3 %v1490_v49  ;;  %v1293_v13 = vmax.f32 %v2796_v12, 1e-10  ;;  %v1491_v28 = vld [vmem:[%s2775_s6 + $0x18] sm:$0xff]  ;;  %v2798_v54 = vld [vmem:[#allocation2_spill] sm:$0xff] }
 0x1fb   :  { %v2075_v8 = vpop.eup %2074  ;;  %2086 = vlog2.f32 %v1240_v23  ;;  %1606 = vmatpush.msra.mxu3 %v1487_v10  ;;  %v1483_v21 = vmul.f32 0.6931472, %v2073_v63  ;;  %v1292_v23 = vmax.f32 %v2797_v3, 1e-10  ;;  %v2799_v17 = vld [vmem:[#allocation3_spill] sm:$0xff]  ;;  %v2800_v10 = vld [vmem:[#allocation5_spill] sm:$0xff] }
 0x1fc   :  { %v2077_v58 = vpop.eup %2076  ;;  %2088 = vlog2.f32 %v1305_v51  ;;  %1528 = vmatpush.msrb.mxu2 %v1355_v42  ;;  %v1351_v16 = vmul.f32 0.6931472, %v2075_v8  ;;  %v1291_v63 = vmax.f32 %v2800_v10, 1e-10  ;;  %1574 = vmatmul.f32.vlgmr.msrb.gmra.mxu1 %v1491_v28  ;;  %v2801_v8 = vld [vmem:[#allocation4_spill] sm:$0xff] }
 0x1fd   :  { %v2079_v53 = vpop.eup %2078  ;;  %2090 = vlog2.f32 %v1302_v11  ;;  %1607 = vmatpush.msra.mxu3 %v1485_v25  ;;  %v1481_v32 = vmul.f32 0.6931472, %v2077_v58  ;;  %v1201_v11 = vmul.f32 %v2799_v17, %v2798_v54  ;;  %v1290_v25 = vmax.f32 %v2801_v8, 1e-10 }
 0x1fe   :  { %v2081_v48 = vpop.eup %2080  ;;  %2092 = vlog2.f32 %v1304_v34  ;;  %1529 = vmatpush.msrb.mxu2 %v1353_v46  ;;  %v1349_v20 = vmul.f32 0.6931472, %v2079_v53  ;;  %v1200_v58 = vmul.f32 %v2799_v17, %v1031_v61 }
 0x1ff   :  { %v2083_v24 = vpop.eup %2082  ;;  %1608 = vmatpush.msra.mxu3 %v1483_v21  ;;  %2094 = vlog2.f32 %v1301_v14  ;;  %v1479_v35 = vmul.f32 0.6931472, %v2081_v48  ;;  %v1289_v53 = vmax.f32 %v1201_v11, 1e-10 }
 0x200   :  { %v2085_v38 = vpop.eup %2084  ;;  %1530 = vmatpush.msrb.mxu2 %v1351_v16  ;;  %2096 = vlog2.f32 %v1300_v56  ;;  %v1347_v1 = vmul.f32 0.6931472, %v2083_v24  ;;  %v1288_v56 = vmax.f32 %v1200_v58, 1e-10 }
 0x201   :  { %v2087_v36 = vpop.eup %2086  ;;  %1609 = vmatpush.msra.mxu3 %v1481_v32  ;;  %v1477_v4 = vmul.f32 0.6931472, %v2085_v38  ;;  %2098 = vlog2.f32 %v1299_v33 }
 0x202   :  { %v2089_v29 = vpop.eup %2088  ;;  %1531 = vmatpush.msrb.mxu2 %v1349_v20  ;;  %v1345_v59 = vmul.f32 0.6931472, %v2087_v36  ;;  %2100 = vlog2.f32 %v1298_v44 }
 0x203   :  { %v2091_v18 = vpop.eup %2090  ;;  %1610 = vmatpush.msra.mxu3 %v1479_v35  ;;  %v1475_v9 = vmul.f32 0.6931472, %v2089_v29  ;;  %2102 = vlog2.f32 %v1297_v15 }
 0x204   :  { %v2093_v22 = vpop.eup %2092  ;;  %1532 = vmatpush.msrb.mxu2 %v1347_v1  ;;  %v1469_v47 = vmul.f32 0.6931472, %v2091_v18  ;;  %2104 = vlog2.f32 %v1296_v2  ;;  %v1492_v18 = vld [vmem:[%s2775_s6 + $0x20] sm:$0xff] }
 0x205   :  { %1611 = vmatpush.msra.mxu3 %v1477_v4  ;;  %v2095_v5 = vpop.eup %2094  ;;  %v1473_v30 = vmul.f32 0.6931472, %v2093_v22  ;;  %2106 = vlog2.f32 %v1295_v45 }
 0x206   :  { %1533 = vmatpush.msrb.mxu2 %v1345_v59  ;;  %v2097_v31 = vpop.eup %2096  ;;  %v1467_v26 = vmul.f32 0.6931472, %v2095_v5  ;;  %2108 = vlog2.f32 %v1294_v27  ;;  %v1618_v5 = vld [vmem:[%s2776_s3] sm:$0xff] }
 0x207   :  { %1612 = vmatpush.msra.mxu3 %v1475_v9  ;;  %1534 = vmatmul.f32.vlgmr.msrb.gmra.mxu2 %v1489_v7  ;;  %v2099_v60 = vpop.eup %2098  ;;  %v1465_v39 = vmul.f32 0.6931472, %v2097_v31  ;;  %2110 = vlog2.f32 %v1293_v13 }
 0x208   :  { %1578 = vmatpush.msra.mxu2 %v1471_v55  ;;  %v2101_v6 = vpop.eup %2100  ;;  %v1463_v0 = vmul.f32 0.6931472, %v2099_v60  ;;  %2112 = vlog2.f32 %v1292_v23 }
 0x209   :  { %1613 = vmatpush.msra.mxu3 %v1473_v30  ;;  %v2103_v37 = vpop.eup %2102  ;;  %v1461_v41 = vmul.f32 0.6931472, %v2101_v6  ;;  %2114 = vlog2.f32 %v1291_v63 }
 0x20a   :  { %1579 = vmatpush.msra.mxu2 %v1469_v47  ;;  %1721 = vmatmul.msk.f32.vlgmr.msra.gmra.mxu3 %vm1494_vm1, %v1493_v19  ;;  %v2105_v51 = vpop.eup %2104  ;;  %v1459_v34 = vmul.f32 0.6931472, %v2103_v37  ;;  %2116 = vlog2.f32 %v1290_v25 }
 0x20b   :  { %v2107_v42 = vpop.eup %2106  ;;  %v1457_v14 = vmul.f32 0.6931472, %v2105_v51  ;;  %2118 = vlog2.f32 %v1289_v53 }
 0x20c   :  { %1580 = vmatpush.msra.mxu2 %v1467_v26  ;;  %v2109_v46 = vpop.eup %2108  ;;  %v1455_v21 = vmul.f32 0.6931472, %v2107_v42  ;;  %2120 = vlog2.f32 %v1288_v56 }
 0x20d   :  { %v2111_v48 = vpop.eup %2110  ;;  %v1453_v16 = vmul.f32 0.6931472, %v2109_v46 }
 0x20e   :  { %1581 = vmatpush.msra.mxu2 %v1465_v39  ;;  %v2113_v24 = vpop.eup %2112  ;;  %v1451_v32 = vmul.f32 0.6931472, %v2111_v48 }
 0x20f   :  { %v2115_v38 = vpop.eup %2114  ;;  %v1449_v33 = vmul.f32 0.6931472, %v2113_v24 }
 0x210   :  { %1582 = vmatpush.msra.mxu2 %v1463_v0  ;;  %v2117_v20 = vpop.eup %2116  ;;  %v1447_v36 = vmul.f32 0.6931472, %v2115_v38 }
 0x211   :  { %v2119_v35 = vpop.eup %2118  ;;  %v1445_v29 = vmul.f32 0.6931472, %v2117_v20 }
 0x212   :  { %1583 = vmatpush.msra.mxu2 %v1461_v41  ;;  %v2121_v43 = vpop.eup %2120  ;;  %v1443_v44 = vmul.f32 0.6931472, %v2119_v35 }
 0x213   :  { %v1441_v1 = vmul.f32 0.6931472, %v2121_v43 }
 0x214   :  { %1584 = vmatpush.msra.mxu2 %v1459_v34 }
 0x216   :  { %1585 = vmatpush.msra.mxu2 %v1457_v14 }
 0x218   :  { %1586 = vmatpush.msra.mxu2 %v1455_v21 }
 0x21a   :  { %1587 = vmatpush.msra.mxu2 %v1453_v16 }
 0x21c   :  { %1588 = vmatpush.msra.mxu2 %v1451_v32 }
 0x21e   :  { %1589 = vmatpush.msra.mxu2 %v1449_v33 }
 0x220   :  { %1590 = vmatpush.msra.mxu2 %v1447_v36 }
 0x222   :  { %1591 = vmatpush.msra.mxu2 %v1445_v29 }
 0x224   :  { %1592 = vmatpush.msra.mxu2 %v1443_v44 }
 0x226   :  { %1593 = vmatpush.msra.mxu2 %v1441_v1 }
 0x227   :  { %1594 = vmatmul.f32.vlgmr.msra.gmra.mxu2 %v1492_v18 }
 0x271   :  { %v1515_v4 = vpop.f32.mrf.mxu1 }
 0x279   :  { %v1575_v59 = vpop.f32.mrf.mxu1 }
 0x27d   :  { %v1555_v15 = vpop.f32.mrf.mxu3 }
 0x28a   :  { %v1535_v22 = vpop.f32.mrf.mxu2 }
 0x28b   :  { %v1536_v57 = vadd.f32 %v1535_v22, %v1515_v4 }
 0x28d   :  { %v1556_v55 = vadd.f32 %v1555_v15, %v1536_v57  ;;  %v1615_v49 = vpop.f32.mrf.mxu3 }
 0x28f   :  { %v1576_v9 = vadd.f32 %v1575_v59, %v1556_v55 }
 0x2aa   :  { %v1595_v7 = vpop.f32.mrf.mxu2 }
 0x2ab   :  { %v1596_v40 = vadd.f32 %v1595_v7, %v1576_v9 }
 0x2ad   :  { %v1616_v62 = vadd.f32 %v1615_v49, %v1596_v40 }
 0x2af   :  { %v1619_v2 = vmul.f32 %v1618_v5, %v1616_v62 }
 0x2b1   :  { %1620 = vst [vmem:[%s2777_s7] sm:$0xff] %v1619_v2 }

</bundles_post_ra>
